<compile_context>
chip_gen: v7x
topology: tpu7x:2x2x1
jax: 0.10.0
libtpu: 0.0.40
codegen_flags: <defaults>
</compile_context>

<pallas_src>
import jax
import jax.numpy as jnp
import numpy as np
from jax.experimental import pallas as pl
from jax.experimental.pallas import tpu as pltpu  # noqa: F401  (TPU backend)

_BN_EPS = 1e-5
# tap -> kernel-index map for the 4-phase decomposition of
# ConvTranspose2d(kernel=4, stride=2, padding=1)
_KTAPS = ((3, 1), (2, 0))


# ----------------------------- Pallas kernels ------------------------------ #

def _linear_kernel(x_ref, w_ref, b_ref, o_ref):
    # fc layer: o = x @ w + b   (bf16 operands, f32 accumulate + epilogue)
    o_ref[...] = (
        jnp.dot(x_ref[...], w_ref[...], preferred_element_type=jnp.float32)
        + b_ref[...]
    )


def _convt4_bn_relu_kernel(pt_ref, wt_ref, g_ref, b_ref, o_ref):
    # 4-phase transposed conv fused with BatchNorm (batch stats) + ReLU.
    #   pt_ref : (4, K, M)    bf16  per-phase patches^T   (K = 4*Cin, M = B*H*W)
    #   wt_ref : (4, Cout, K) bf16  per-phase weights^T
    #   g_ref  : (Cout, 1)    f32   BN gamma
    #   b_ref  : (Cout, 1)    f32   BN beta
    #   o_ref  : (4, Cout, M) f32   lane-dense along M
    m = pt_ref.shape[2]
    ys = [jnp.dot(wt_ref[p, :, :], pt_ref[p, :, :],
                  preferred_element_type=jnp.float32)
          for p in range(4)]                                      # (Cout, M) f32
    # single-pass batch stats over all 4*M output positions per channel
    s1 = sum(jnp.sum(y, axis=1, keepdims=True) for y in ys)       # (Cout, 1)
    s2 = sum(jnp.sum(y * y, axis=1, keepdims=True) for y in ys)   # (Cout, 1)
    inv_n = 1.0 / (4.0 * m)
    mean = s1 * inv_n
    var = s2 * inv_n - mean * mean
    scale = jax.lax.rsqrt(var + _BN_EPS) * g_ref[...]
    shift = b_ref[...] - mean * scale
    for p in range(4):
        o_ref[p, :, :] = jnp.maximum(ys[p] * scale + shift, 0.0)


def _convt4_tanh_kernel(pt_ref, wt_ref, o_ref):
    # final 4-phase transposed conv fused with tanh
    for p in range(4):
        y = jnp.dot(wt_ref[p, :, :], pt_ref[p, :, :],
                    preferred_element_type=jnp.float32)
        o_ref[p, :, :] = jnp.tanh(y)


# ---------------------------- pallas_call wrappers -------------------------- #

def _fs(shape):
    # tiny problem -> single grid step, whole-array blocks resident in VMEM
    return pl.BlockSpec(shape, lambda i: (0,) * len(shape))


def pallas_linear(x, w_t, b):
    m, k = x.shape
    n = w_t.shape[1]
    return pl.pallas_call(
        _linear_kernel,
        out_shape=jax.ShapeDtypeStruct((m, n), jnp.float32),
        grid=(1,),
        in_specs=[_fs((m, k)), _fs((k, n)), _fs((1, n))],
        out_specs=_fs((m, n)),
    )(x, w_t, b)


def pallas_convt4_bn_relu(pt, wt, gamma, beta):
    _, k, m = pt.shape
    cout = wt.shape[1]
    return pl.pallas_call(
        _convt4_bn_relu_kernel,
        out_shape=jax.ShapeDtypeStruct((4, cout, m), jnp.float32),
        grid=(1,),
        in_specs=[_fs((4, k, m)), _fs((4, cout, k)),
                  _fs((cout, 1)), _fs((cout, 1))],
        out_specs=_fs((4, cout, m)),
    )(pt, wt, gamma, beta)


def pallas_convt4_tanh(pt, wt):
    _, k, m = pt.shape
    cout = wt.shape[1]
    return pl.pallas_call(
        _convt4_tanh_kernel,
        out_shape=jax.ShapeDtypeStruct((4, cout, m), jnp.float32),
        grid=(1,),
        in_specs=[_fs((4, k, m)), _fs((4, cout, k))],
        out_specs=_fs((4, cout, m)),
    )(pt, wt)


# ------------------------------ JAX glue (fused under jit) ------------------ #

def _phase_patches_t(h):
    """NHWC activation (B,H,W,C) -> (4, 4*C, B*H*W) bf16 transposed patch
    matrices, one per output parity of ConvTranspose2d(k=4, s=2, p=1)."""
    b, hh, ww, c = h.shape
    xp = jnp.pad(h.astype(jnp.bfloat16), ((0, 0), (1, 1), (1, 1), (0, 0)))
    xp = jnp.transpose(xp, (3, 0, 1, 2))                    # (C, B, H+2, W+2)
    phases = []
    for po in range(2):
        for pw in range(2):
            taps = [xp[:, :, po + tr:po + tr + hh, pw + tc:pw + tc + ww]
                    for tr in range(2) for tc in range(2)]  # each (C, B, H, W)
            phases.append(jnp.stack(taps, axis=0).reshape(4 * c, b * hh * ww))
    return jnp.stack(phases, axis=0)                        # (4, 4C, M)


def _phase_weights_t(w):
    """PyTorch ConvTranspose2d weight (Cin, Cout, 4, 4) -> (4, Cout, 4*Cin)
    per-phase transposed matmul weights (tap order matches _phase_patches_t)."""
    cin, cout = w.shape[0], w.shape[1]
    phases = []
    for po in range(2):
        for pw in range(2):
            taps = [w[:, :, _KTAPS[po][tr], _KTAPS[pw][tc]]
                    for tr in range(2) for tc in range(2)]  # each (Cin, Cout)
            phases.append(jnp.stack(taps, axis=0).reshape(4 * cin, cout).T)
    return jnp.stack(phases, axis=0)                        # (4, Cout, 4Cin)


def _assemble_phases(o, b, hh, ww):
    """(4, Cout, B*H*W) phase outputs -> NHWC (B, 2H, 2W, Cout)."""
    cout = o.shape[1]
    o = o.reshape(2, 2, cout, b, hh, ww)                    # (po, pw, c, b, i, j)
    o = jnp.transpose(o, (3, 4, 0, 5, 1, 2))                # (b, i, po, j, pw, c)
    return o.reshape(b, 2 * hh, 2 * ww, cout)


def prepare_params(params, conv_dim):
    """One-time weight re-layout, hoisted out of the jitted forward path."""
    del conv_dim  # shapes carry all needed info
    prep = {
        "fc_wT": jnp.asarray(params["fc_w"]).T.astype(jnp.bfloat16),
        "fc_b": jnp.asarray(params["fc_b"], jnp.float32)[None, :],
    }
    for i in (1, 2, 3, 4):
        prep[f"wT{i}"] = _phase_weights_t(params[f"w{i}"]).astype(jnp.bfloat16)
    for i in (1, 2, 3):
        prep[f"gamma{i}"] = jnp.asarray(params[f"gamma{i}"], jnp.float32).reshape(-1, 1)
        prep[f"beta{i}"] = jnp.asarray(params[f"beta{i}"], jnp.float32).reshape(-1, 1)
    return prep


def generator_forward(x, prep, *, conv_dim):
    b = x.shape[0]
    h = pallas_linear(x.astype(jnp.bfloat16), prep["fc_wT"], prep["fc_b"])
    h = h.reshape(b, conv_dim, 2, 2)             # PyTorch .view (NCHW)
    h = jnp.transpose(h, (0, 2, 3, 1))           # NHWC (B, 2, 2, conv_dim)
    for i in (1, 2, 3):
        hh, ww = h.shape[1], h.shape[2]
        pt = _phase_patches_t(h)
        o = pallas_convt4_bn_relu(pt, prep[f"wT{i}"],
                                  prep[f"gamma{i}"], prep[f"beta{i}"])
        h = _assemble_phases(o, b, hh, ww)
    hh, ww = h.shape[1], h.shape[2]
    pt = _phase_patches_t(h)
    o = pallas_convt4_tanh(pt, prep["wT4"])
    out = _assemble_phases(o, b, hh, ww)         # (B, 32, 32, 3)
    return jnp.transpose(out, (0, 3, 1, 2))      # NCHW to match PyTorch


generator_forward_jit = jax.jit(generator_forward, static_argnames=("conv_dim",))


# --------------------------- numpy reference -------------------------------- #

def _np_convT(x, w, stride=2, pad=1):
    # x: (B, Cin, H, W), w: (Cin, Cout, k, k)   [PyTorch ConvTranspose2d semantics]
    B, Cin, H, W = x.shape
    _, Cout, k, _ = w.shape
    OH = (H - 1) * stride - 2 * pad + k
    OW = (W - 1) * stride - 2 * pad + k
    out = np.zeros((B, Cout, OH, OW), np.float64)
    for ih in range(H):
        for iw in range(W):
            contrib = np.einsum("bi,iokl->bokl", x[:, :, ih, iw], w)
            for kh in range(k):
                oh = ih * stride - pad + kh
                if not (0 <= oh < OH):
                    continue
                for kw in range(k):
                    ow = iw * stride - pad + kw
                    if not (0 <= ow < OW):
                        continue
                    out[:, :, oh, ow] += contrib[:, :, kh, kw]
    return out


def _np_bn_relu(y):
    mean = y.mean(axis=(0, 2, 3), keepdims=True)
    var = ((y - mean) ** 2).mean(axis=(0, 2, 3), keepdims=True)
    return np.maximum((y - mean) / np.sqrt(var + _BN_EPS), 0.0)


def numpy_reference(x, params, conv_dim):
    x = np.asarray(x, np.float64)
    fw = np.asarray(params["fc_w"], np.float64)
    fb = np.asarray(params["fc_b"], np.float64)
    h = x @ fw.T + fb
    B = x.shape[0]
    h = h.reshape(B, conv_dim, 2, 2)
    for i in (1, 2, 3):
        h = _np_bn_relu(_np_convT(h, np.asarray(params[f"w{i}"], np.float64)))
    h = _np_convT(h, np.asarray(params["w4"], np.float64))
    return np.tanh(h)


# --------------------------------- main ------------------------------------- #

if __name__ == "__main__":
    z_size, conv_dim, batch = 16, 4, 2

    key = jax.random.PRNGKey(0)
    k_fc_w, k_fc_b, k_w1, k_w2, k_w3, k_w4, k_x = jax.random.split(key, 7)

    params = {
        "fc_w": jax.random.normal(k_fc_w, (conv_dim * 4, z_size), jnp.float32) * 0.2,
        "fc_b": jax.random.normal(k_fc_b, (conv_dim * 4,), jnp.float32) * 0.1,
        # ConvTranspose2d weights: (Cin, Cout, 4, 4)
        "w1": jax.random.normal(k_w1, (conv_dim, conv_dim * 8, 4, 4), jnp.float32) * 0.1,
        "w2": jax.random.normal(k_w2, (conv_dim * 8, conv_dim * 4, 4, 4), jnp.float32) * 0.1,
        "w3": jax.random.normal(k_w3, (conv_dim * 4, conv_dim * 2, 4, 4), jnp.float32) * 0.1,
        "w4": jax.random.normal(k_w4, (conv_dim * 2, 3, 4, 4), jnp.float32) * 0.1,
        # BatchNorm affine params at PyTorch default init (weight=1, bias=0)
        "gamma1": jnp.ones((conv_dim * 8,), jnp.float32),
        "beta1": jnp.zeros((conv_dim * 8,), jnp.float32),
        "gamma2": jnp.ones((conv_dim * 4,), jnp.float32),
        "beta2": jnp.zeros((conv_dim * 4,), jnp.float32),
        "gamma3": jnp.ones((conv_dim * 2,), jnp.float32),
        "beta3": jnp.zeros((conv_dim * 2,), jnp.float32),
    }

    x = jax.random.normal(k_x, (batch, z_size), jnp.float32)

    prep = prepare_params(params, conv_dim)           # hoisted weight re-layout
    out = generator_forward_jit(x, prep, conv_dim=conv_dim)
    out = jax.block_until_ready(out)

    assert out.shape == (batch, 3, 32, 32), out.shape
    assert out.dtype == jnp.float32

    ref = numpy_reference(x, params, conv_dim)
    np.testing.assert_allclose(np.asarray(out), ref, rtol=2e-2, atol=2e-2)

    print("KERNEL_OK")
</pallas_src>

<mosaic_0001>
module attributes {stable_mosaic.version = 11 : i64} {
  func.func @_linear_kernel(%arg0: i32, %arg1: memref<2x16xbf16, #tpu.memory_space<vmem>>, %arg2: memref<16x16xbf16, #tpu.memory_space<vmem>>, %arg3: memref<1x16xf32, #tpu.memory_space<vmem>>, %arg4: memref<2x16xf32, #tpu.memory_space<vmem>>) attributes {dimension_semantics = [#tpu.dimension_semantics<arbitrary>], iteration_bounds = array<i64: 1>, scalar_prefetch = 0 : i64, scratch_operands = 0 : i64, tpu.core_type = #tpu.core_type<tc>, window_params = [{pipeline_mode = #tpu.pipeline_mode<synchronous>, transform_indices = @transform_0, window_bounds = array<i64: 2, 16>}, {pipeline_mode = #tpu.pipeline_mode<synchronous>, transform_indices = @transform_1, window_bounds = array<i64: 16, 16>}, {pipeline_mode = #tpu.pipeline_mode<synchronous>, transform_indices = @transform_2, window_bounds = array<i64: 1, 16>}, {pipeline_mode = #tpu.pipeline_mode<synchronous>, transform_indices = @transform_3, window_bounds = array<i64: 2, 16>}]} {
    %c0 = arith.constant 0 : index
    %c0_0 = arith.constant 0 : index
    %0 = vector.load %arg1[%c0, %c0_0] : memref<2x16xbf16, #tpu.memory_space<vmem>>, vector<2x16xbf16>
    %c0_1 = arith.constant 0 : index
    %c0_2 = arith.constant 0 : index
    %1 = vector.load %arg2[%c0_1, %c0_2] : memref<16x16xbf16, #tpu.memory_space<vmem>>, vector<16x16xbf16>
    %cst = arith.constant dense<0.000000e+00> : vector<2x16xf32>
    %2 = tpu.matmul %0, %1, %cst {dimension_numbers = #tpu.dot_dimension_numbers<[1], [0], [0], [1], [0, 0, 1, 1], [], []>} : vector<2x16xbf16>, vector<16x16xbf16>, vector<2x16xf32> -> vector<2x16xf32>
    %c0_3 = arith.constant 0 : index
    %c0_4 = arith.constant 0 : index
    %3 = vector.load %arg3[%c0_3, %c0_4] : memref<1x16xf32, #tpu.memory_space<vmem>>, vector<1x16xf32>
    %4 = vector.broadcast %3 : vector<1x16xf32> to vector<2x16xf32>
    %5 = arith.addf %2, %4 : vector<2x16xf32>
    %c0_5 = arith.constant 0 : index
    %c0_6 = arith.constant 0 : index
    %6 = vector.load %arg4[%c0_5, %c0_6] : memref<2x16xf32, #tpu.memory_space<vmem>>, vector<2x16xf32>
    tpu.vector_store %arg4[%c0_5, %c0_6], %5 {strides = array<i32>} : memref<2x16xf32, #tpu.memory_space<vmem>>, vector<2x16xf32>,
    return
  }
  func.func @transform_0(%arg0: i32) -> (i32, i32) {
    %c0_i32 = arith.constant 0 : i32
    %c0_i32_0 = arith.constant 0 : i32
    %c0_i32_1 = arith.constant 0 : i32
    return %c0_i32, %c0_i32_0 : i32, i32
  }
  func.func @transform_1(%arg0: i32) -> (i32, i32) {
    %c0_i32 = arith.constant 0 : i32
    %c0_i32_0 = arith.constant 0 : i32
    %c0_i32_1 = arith.constant 0 : i32
    return %c0_i32, %c0_i32_0 : i32, i32
  }
  func.func @transform_2(%arg0: i32) -> (i32, i32) {
    %c0_i32 = arith.constant 0 : i32
    %c0_i32_0 = arith.constant 0 : i32
    %c0_i32_1 = arith.constant 0 : i32
    return %c0_i32, %c0_i32_0 : i32, i32
  }
  func.func @transform_3(%arg0: i32) -> (i32, i32) {
    %c0_i32 = arith.constant 0 : i32
    %c0_i32_0 = arith.constant 0 : i32
    %c0_i32_1 = arith.constant 0 : i32
    return %c0_i32, %c0_i32_0 : i32, i32
  }
}

module attributes {stable_mosaic.version = 11 : i64} {
  func.func @_convt4_bn_relu_kernel(%arg0: i32, %arg1: memref<4x16x8xbf16, #tpu.memory_space<vmem>>, %arg2: memref<4x32x16xbf16, #tpu.memory_space<vmem>>, %arg3: memref<32x1xf32, #tpu.memory_space<vmem>>, %arg4: memref<32x1xf32, #tpu.memory_space<vmem>>, %arg5: memref<4x32x8xf32, #tpu.memory_space<vmem>>) attributes {dimension_semantics = [#tpu.dimension_semantics<arbitrary>], iteration_bounds = array<i64: 1>, scalar_prefetch = 0 : i64, scratch_operands = 0 : i64, tpu.core_type = #tpu.core_type<tc>, window_params = [{pipeline_mode = #tpu.pipeline_mode<synchronous>, transform_indices = @transform_0, window_bounds = array<i64: 4, 16, 8>}, {pipeline_mode = #tpu.pipeline_mode<synchronous>, transform_indices = @transform_1, window_bounds = array<i64: 4, 32, 16>}, {pipeline_mode = #tpu.pipeline_mode<synchronous>, transform_indices = @transform_2, window_bounds = array<i64: 32, 1>}, {pipeline_mode = #tpu.pipeline_mode<synchronous>, transform_indices = @transform_3, window_bounds = array<i64: 32, 1>}, {pipeline_mode = #tpu.pipeline_mode<synchronous>, transform_indices = @transform_4, window_bounds = array<i64: 4, 32, 8>}]} {
    %c0 = arith.constant 0 : index
    %c0_0 = arith.constant 0 : index
    %c0_1 = arith.constant 0 : index
    %0 = vector.load %arg2[%c0, %c0_0, %c0_1] : memref<4x32x16xbf16, #tpu.memory_space<vmem>>, vector<1x32x16xbf16>
    %1 = vector.shape_cast %0 : vector<1x32x16xbf16> to vector<32x16xbf16>
    %c0_2 = arith.constant 0 : index
    %c0_3 = arith.constant 0 : index
    %c0_4 = arith.constant 0 : index
    %2 = vector.load %arg1[%c0_2, %c0_3, %c0_4] : memref<4x16x8xbf16, #tpu.memory_space<vmem>>, vector<1x16x8xbf16>
    %3 = vector.shape_cast %2 : vector<1x16x8xbf16> to vector<16x8xbf16>
    %cst = arith.constant dense<0.000000e+00> : vector<32x8xf32>
    %4 = tpu.matmul %1, %3, %cst {dimension_numbers = #tpu.dot_dimension_numbers<[1], [0], [0], [1], [0, 0, 1, 1], [], []>} : vector<32x16xbf16>, vector<16x8xbf16>, vector<32x8xf32> -> vector<32x8xf32>
    %c1 = arith.constant 1 : index
    %c0_5 = arith.constant 0 : index
    %c0_6 = arith.constant 0 : index
    %5 = vector.load %arg2[%c1, %c0_5, %c0_6] : memref<4x32x16xbf16, #tpu.memory_space<vmem>>, vector<1x32x16xbf16>
    %6 = vector.shape_cast %5 : vector<1x32x16xbf16> to vector<32x16xbf16>
    %c1_7 = arith.constant 1 : index
    %c0_8 = arith.constant 0 : index
    %c0_9 = arith.constant 0 : index
    %7 = vector.load %arg1[%c1_7, %c0_8, %c0_9] : memref<4x16x8xbf16, #tpu.memory_space<vmem>>, vector<1x16x8xbf16>
    %8 = vector.shape_cast %7 : vector<1x16x8xbf16> to vector<16x8xbf16>
    %cst_10 = arith.constant dense<0.000000e+00> : vector<32x8xf32>
    %9 = tpu.matmul %6, %8, %cst_10 {dimension_numbers = #tpu.dot_dimension_numbers<[1], [0], [0], [1], [0, 0, 1, 1], [], []>} : vector<32x16xbf16>, vector<16x8xbf16>, vector<32x8xf32> -> vector<32x8xf32>
    %c2 = arith.constant 2 : index
    %c0_11 = arith.constant 0 : index
    %c0_12 = arith.constant 0 : index
    %10 = vector.load %arg2[%c2, %c0_11, %c0_12] : memref<4x32x16xbf16, #tpu.memory_space<vmem>>, vector<1x32x16xbf16>
    %11 = vector.shape_cast %10 : vector<1x32x16xbf16> to vector<32x16xbf16>
    %c2_13 = arith.constant 2 : index
    %c0_14 = arith.constant 0 : index
    %c0_15 = arith.constant 0 : index
    %12 = vector.load %arg1[%c2_13, %c0_14, %c0_15] : memref<4x16x8xbf16, #tpu.memory_space<vmem>>, vector<1x16x8xbf16>
    %13 = vector.shape_cast %12 : vector<1x16x8xbf16> to vector<16x8xbf16>
    %cst_16 = arith.constant dense<0.000000e+00> : vector<32x8xf32>
    %14 = tpu.matmul %11, %13, %cst_16 {dimension_numbers = #tpu.dot_dimension_numbers<[1], [0], [0], [1], [0, 0, 1, 1], [], []>} : vector<32x16xbf16>, vector<16x8xbf16>, vector<32x8xf32> -> vector<32x8xf32>
    %c3 = arith.constant 3 : index
    %c0_17 = arith.constant 0 : index
    %c0_18 = arith.constant 0 : index
    %15 = vector.load %arg2[%c3, %c0_17, %c0_18] : memref<4x32x16xbf16, #tpu.memory_space<vmem>>, vector<1x32x16xbf16>
    %16 = vector.shape_cast %15 : vector<1x32x16xbf16> to vector<32x16xbf16>
    %c3_19 = arith.constant 3 : index
    %c0_20 = arith.constant 0 : index
    %c0_21 = arith.constant 0 : index
    %17 = vector.load %arg1[%c3_19, %c0_20, %c0_21] : memref<4x16x8xbf16, #tpu.memory_space<vmem>>, vector<1x16x8xbf16>
    %18 = vector.shape_cast %17 : vector<1x16x8xbf16> to vector<16x8xbf16>
    %cst_22 = arith.constant dense<0.000000e+00> : vector<32x8xf32>
    %19 = tpu.matmul %16, %18, %cst_22 {dimension_numbers = #tpu.dot_dimension_numbers<[1], [0], [0], [1], [0, 0, 1, 1], [], []>} : vector<32x16xbf16>, vector<16x8xbf16>, vector<32x8xf32> -> vector<32x8xf32>
    %cst_23 = arith.constant dense<0.000000e+00> : vector<32xf32>
    %20 = vector.multi_reduction <add>, %4, %cst_23 [1] : vector<32x8xf32> to vector<32xf32>
    %21 = vector.shape_cast %20 : vector<32xf32> to vector<32x1xf32>
    %cst_24 = arith.constant 0.000000e+00 : f32
    %22 = vector.broadcast %cst_24 : f32 to vector<32x1xf32>
    %23 = arith.addf %22, %21 : vector<32x1xf32>
    %cst_25 = arith.constant dense<0.000000e+00> : vector<32xf32>
    %24 = vector.multi_reduction <add>, %9, %cst_25 [1] : vector<32x8xf32> to vector<32xf32>
    %25 = vector.shape_cast %24 : vector<32xf32> to vector<32x1xf32>
    %26 = arith.addf %23, %25 : vector<32x1xf32>
    %cst_26 = arith.constant dense<0.000000e+00> : vector<32xf32>
    %27 = vector.multi_reduction <add>, %14, %cst_26 [1] : vector<32x8xf32> to vector<32xf32>
    %28 = vector.shape_cast %27 : vector<32xf32> to vector<32x1xf32>
    %29 = arith.addf %26, %28 : vector<32x1xf32>
    %cst_27 = arith.constant dense<0.000000e+00> : vector<32xf32>
    %30 = vector.multi_reduction <add>, %19, %cst_27 [1] : vector<32x8xf32> to vector<32xf32>
    %31 = vector.shape_cast %30 : vector<32xf32> to vector<32x1xf32>
    %32 = arith.addf %29, %31 : vector<32x1xf32>
    %33 = arith.mulf %4, %4 : vector<32x8xf32>
    %cst_28 = arith.constant dense<0.000000e+00> : vector<32xf32>
    %34 = vector.multi_reduction <add>, %33, %cst_28 [1] : vector<32x8xf32> to vector<32xf32>
    %35 = vector.shape_cast %34 : vector<32xf32> to vector<32x1xf32>
    %cst_29 = arith.constant 0.000000e+00 : f32
    %36 = vector.broadcast %cst_29 : f32 to vector<32x1xf32>
    %37 = arith.addf %36, %35 : vector<32x1xf32>
    %38 = arith.mulf %9, %9 : vector<32x8xf32>
    %cst_30 = arith.constant dense<0.000000e+00> : vector<32xf32>
    %39 = vector.multi_reduction <add>, %38, %cst_30 [1] : vector<32x8xf32> to vector<32xf32>
    %40 = vector.shape_cast %39 : vector<32xf32> to vector<32x1xf32>
    %41 = arith.addf %37, %40 : vector<32x1xf32>
    %42 = arith.mulf %14, %14 : vector<32x8xf32>
    %cst_31 = arith.constant dense<0.000000e+00> : vector<32xf32>
    %43 = vector.multi_reduction <add>, %42, %cst_31 [1] : vector<32x8xf32> to vector<32xf32>
    %44 = vector.shape_cast %43 : vector<32xf32> to vector<32x1xf32>
    %45 = arith.addf %41, %44 : vector<32x1xf32>
    %46 = arith.mulf %19, %19 : vector<32x8xf32>
    %cst_32 = arith.constant dense<0.000000e+00> : vector<32xf32>
    %47 = vector.multi_reduction <add>, %46, %cst_32 [1] : vector<32x8xf32> to vector<32xf32>
    %48 = vector.shape_cast %47 : vector<32xf32> to vector<32x1xf32>
    %49 = arith.addf %45, %48 : vector<32x1xf32>
    %cst_33 = arith.constant 3.125000e-02 : f32
    %50 = vector.broadcast %cst_33 : f32 to vector<32x1xf32>
    %51 = arith.mulf %32, %50 : vector<32x1xf32>
    %cst_34 = arith.constant 3.125000e-02 : f32
    %52 = vector.broadcast %cst_34 : f32 to vector<32x1xf32>
    %53 = arith.mulf %49, %52 : vector<32x1xf32>
    %54 = arith.mulf %51, %51 : vector<32x1xf32>
    %55 = arith.subf %53, %54 : vector<32x1xf32>
    %cst_35 = arith.constant 9.99999974E-6 : f32
    %56 = vector.broadcast %cst_35 : f32 to vector<32x1xf32>
    %57 = arith.addf %55, %56 : vector<32x1xf32>
    %58 = math.rsqrt %57 : vector<32x1xf32>
    %c0_36 = arith.constant 0 : index
    %c0_37 = arith.constant 0 : index
    %59 = vector.load %arg3[%c0_36, %c0_37] : memref<32x1xf32, #tpu.memory_space<vmem>>, vector<32x1xf32>
    %60 = arith.mulf %58, %59 : vector<32x1xf32>
    %c0_38 = arith.constant 0 : index
    %c0_39 = arith.constant 0 : index
    %61 = vector.load %arg4[%c0_38, %c0_39] : memref<32x1xf32, #tpu.memory_space<vmem>>, vector<32x1xf32>
    %62 = arith.mulf %51, %60 : vector<32x1xf32>
    %63 = arith.subf %61, %62 : vector<32x1xf32>
    %64 = vector.broadcast %60 : vector<32x1xf32> to vector<32x8xf32>
    %65 = arith.mulf %4, %64 : vector<32x8xf32>
    %66 = vector.broadcast %63 : vector<32x1xf32> to vector<32x8xf32>
    %67 = arith.addf %65, %66 : vector<32x8xf32>
    %cst_40 = arith.constant 0.000000e+00 : f32
    %68 = vector.broadcast %cst_40 : f32 to vector<32x8xf32>
    %69 = arith.maximumf %67, %68 : vector<32x8xf32>
    %c0_41 = arith.constant 0 : index
    %c0_42 = arith.constant 0 : index
    %c0_43 = arith.constant 0 : index
    %70 = vector.load %arg5[%c0_41, %c0_42, %c0_43] : memref<4x32x8xf32, #tpu.memory_space<vmem>>, vector<1x32x8xf32>
    %71 = vector.shape_cast %70 : vector<1x32x8xf32> to vector<32x8xf32>
    %72 = vector.shape_cast %69 : vector<32x8xf32> to vector<1x32x8xf32>
    tpu.vector_store %arg5[%c0_41, %c0_42, %c0_43], %72 {strides = array<i32>} : memref<4x32x8xf32, #tpu.memory_space<vmem>>, vector<1x32x8xf32>,
    %73 = vector.broadcast %60 : vector<32x1xf32> to vector<32x8xf32>
    %74 = arith.mulf %9, %73 : vector<32x8xf32>
    %75 = vector.broadcast %63 : vector<32x1xf32> to vector<32x8xf32>
    %76 = arith.addf %74, %75 : vector<32x8xf32>
    %cst_44 = arith.constant 0.000000e+00 : f32
    %77 = vector.broadcast %cst_44 : f32 to vector<32x8xf32>
    %78 = arith.maximumf %76, %77 : vector<32x8xf32>
    %c1_45 = arith.constant 1 : index
    %c0_46 = arith.constant 0 : index
    %c0_47 = arith.constant 0 : index
    %79 = vector.load %arg5[%c1_45, %c0_46, %c0_47] : memref<4x32x8xf32, #tpu.memory_space<vmem>>, vector<1x32x8xf32>
    %80 = vector.shape_cast %79 : vector<1x32x8xf32> to vector<32x8xf32>
    %81 = vector.shape_cast %78 : vector<32x8xf32> to vector<1x32x8xf32>
    tpu.vector_store %arg5[%c1_45, %c0_46, %c0_47], %81 {strides = array<i32>} : memref<4x32x8xf32, #tpu.memory_space<vmem>>, vector<1x32x8xf32>,
    %82 = vector.broadcast %60 : vector<32x1xf32> to vector<32x8xf32>
    %83 = arith.mulf %14, %82 : vector<32x8xf32>
    %84 = vector.broadcast %63 : vector<32x1xf32> to vector<32x8xf32>
    %85 = arith.addf %83, %84 : vector<32x8xf32>
    %cst_48 = arith.constant 0.000000e+00 : f32
    %86 = vector.broadcast %cst_48 : f32 to vector<32x8xf32>
    %87 = arith.maximumf %85, %86 : vector<32x8xf32>
    %c2_49 = arith.constant 2 : index
    %c0_50 = arith.constant 0 : index
    %c0_51 = arith.constant 0 : index
    %88 = vector.load %arg5[%c2_49, %c0_50, %c0_51] : memref<4x32x8xf32, #tpu.memory_space<vmem>>, vector<1x32x8xf32>
    %89 = vector.shape_cast %88 : vector<1x32x8xf32> to vector<32x8xf32>
    %90 = vector.shape_cast %87 : vector<32x8xf32> to vector<1x32x8xf32>
    tpu.vector_store %arg5[%c2_49, %c0_50, %c0_51], %90 {strides = array<i32>} : memref<4x32x8xf32, #tpu.memory_space<vmem>>, vector<1x32x8xf32>,
    %91 = vector.broadcast %60 : vector<32x1xf32> to vector<32x8xf32>
    %92 = arith.mulf %19, %91 : vector<32x8xf32>
    %93 = vector.broadcast %63 : vector<32x1xf32> to vector<32x8xf32>
    %94 = arith.addf %92, %93 : vector<32x8xf32>
    %cst_52 = arith.constant 0.000000e+00 : f32
    %95 = vector.broadcast %cst_52 : f32 to vector<32x8xf32>
    %96 = arith.maximumf %94, %95 : vector<32x8xf32>
    %c3_53 = arith.constant 3 : index
    %c0_54 = arith.constant 0 : index
    %c0_55 = arith.constant 0 : index
    %97 = vector.load %arg5[%c3_53, %c0_54, %c0_55] : memref<4x32x8xf32, #tpu.memory_space<vmem>>, vector<1x32x8xf32>
    %98 = vector.shape_cast %97 : vector<1x32x8xf32> to vector<32x8xf32>
    %99 = vector.shape_cast %96 : vector<32x8xf32> to vector<1x32x8xf32>
    tpu.vector_store %arg5[%c3_53, %c0_54, %c0_55], %99 {strides = array<i32>} : memref<4x32x8xf32, #tpu.memory_space<vmem>>, vector<1x32x8xf32>,
    return
  }
  func.func @transform_0(%arg0: i32) -> (i32, i32, i32) {
    %c0_i32 = arith.constant 0 : i32
    %c0_i32_0 = arith.constant 0 : i32
    %c0_i32_1 = arith.constant 0 : i32
    %c0_i32_2 = arith.constant 0 : i32
    return %c0_i32, %c0_i32_0, %c0_i32_1 : i32, i32, i32
  }
  func.func @transform_1(%arg0: i32) -> (i32, i32, i32) {
    %c0_i32 = arith.constant 0 : i32
    %c0_i32_0 = arith.constant 0 : i32
    %c0_i32_1 = arith.constant 0 : i32
    %c0_i32_2 = arith.constant 0 : i32
    return %c0_i32, %c0_i32_0, %c0_i32_1 : i32, i32, i32
  }
  func.func @transform_2(%arg0: i32) -> (i32, i32) {
    %c0_i32 = arith.constant 0 : i32
    %c0_i32_0 = arith.constant 0 : i32
    %c0_i32_1 = arith.constant 0 : i32
    return %c0_i32, %c0_i32_0 : i32, i32
  }
  func.func @transform_3(%arg0: i32) -> (i32, i32) {
    %c0_i32 = arith.constant 0 : i32
    %c0_i32_0 = arith.constant 0 : i32
    %c0_i32_1 = arith.constant 0 : i32
    return %c0_i32, %c0_i32_0 : i32, i32
  }
  func.func @transform_4(%arg0: i32) -> (i32, i32, i32) {
    %c0_i32 = arith.constant 0 : i32
    %c0_i32_0 = arith.constant 0 : i32
    %c0_i32_1 = arith.constant 0 : i32
    %c0_i32_2 = arith.constant 0 : i32
    return %c0_i32, %c0_i32_0, %c0_i32_1 : i32, i32, i32
  }
}

module attributes {stable_mosaic.version = 11 : i64} {
  func.func @_convt4_bn_relu_kernel(%arg0: i32, %arg1: memref<4x128x32xbf16, #tpu.memory_space<vmem>>, %arg2: memref<4x16x128xbf16, #tpu.memory_space<vmem>>, %arg3: memref<16x1xf32, #tpu.memory_space<vmem>>, %arg4: memref<16x1xf32, #tpu.memory_space<vmem>>, %arg5: memref<4x16x32xf32, #tpu.memory_space<vmem>>) attributes {dimension_semantics = [#tpu.dimension_semantics<arbitrary>], iteration_bounds = array<i64: 1>, scalar_prefetch = 0 : i64, scratch_operands = 0 : i64, tpu.core_type = #tpu.core_type<tc>, window_params = [{pipeline_mode = #tpu.pipeline_mode<synchronous>, transform_indices = @transform_0, window_bounds = array<i64: 4, 128, 32>}, {pipeline_mode = #tpu.pipeline_mode<synchronous>, transform_indices = @transform_1, window_bounds = array<i64: 4, 16, 128>}, {pipeline_mode = #tpu.pipeline_mode<synchronous>, transform_indices = @transform_2, window_bounds = array<i64: 16, 1>}, {pipeline_mode = #tpu.pipeline_mode<synchronous>, transform_indices = @transform_3, window_bounds = array<i64: 16, 1>}, {pipeline_mode = #tpu.pipeline_mode<synchronous>, transform_indices = @transform_4, window_bounds = array<i64: 4, 16, 32>}]} {
    %c0 = arith.constant 0 : index
    %c0_0 = arith.constant 0 : index
    %c0_1 = arith.constant 0 : index
    %0 = vector.load %arg2[%c0, %c0_0, %c0_1] : memref<4x16x128xbf16, #tpu.memory_space<vmem>>, vector<1x16x128xbf16>
    %1 = vector.shape_cast %0 : vector<1x16x128xbf16> to vector<16x128xbf16>
    %c0_2 = arith.constant 0 : index
    %c0_3 = arith.constant 0 : index
    %c0_4 = arith.constant 0 : index
    %2 = vector.load %arg1[%c0_2, %c0_3, %c0_4] : memref<4x128x32xbf16, #tpu.memory_space<vmem>>, vector<1x128x32xbf16>
    %3 = vector.shape_cast %2 : vector<1x128x32xbf16> to vector<128x32xbf16>
    %cst = arith.constant dense<0.000000e+00> : vector<16x32xf32>
    %4 = tpu.matmul %1, %3, %cst {dimension_numbers = #tpu.dot_dimension_numbers<[1], [0], [0], [1], [0, 0, 1, 1], [], []>} : vector<16x128xbf16>, vector<128x32xbf16>, vector<16x32xf32> -> vector<16x32xf32>
    %c1 = arith.constant 1 : index
    %c0_5 = arith.constant 0 : index
    %c0_6 = arith.constant 0 : index
    %5 = vector.load %arg2[%c1, %c0_5, %c0_6] : memref<4x16x128xbf16, #tpu.memory_space<vmem>>, vector<1x16x128xbf16>
    %6 = vector.shape_cast %5 : vector<1x16x128xbf16> to vector<16x128xbf16>
    %c1_7 = arith.constant 1 : index
    %c0_8 = arith.constant 0 : index
    %c0_9 = arith.constant 0 : index
    %7 = vector.load %arg1[%c1_7, %c0_8, %c0_9] : memref<4x128x32xbf16, #tpu.memory_space<vmem>>, vector<1x128x32xbf16>
    %8 = vector.shape_cast %7 : vector<1x128x32xbf16> to vector<128x32xbf16>
    %cst_10 = arith.constant dense<0.000000e+00> : vector<16x32xf32>
    %9 = tpu.matmul %6, %8, %cst_10 {dimension_numbers = #tpu.dot_dimension_numbers<[1], [0], [0], [1], [0, 0, 1, 1], [], []>} : vector<16x128xbf16>, vector<128x32xbf16>, vector<16x32xf32> -> vector<16x32xf32>
    %c2 = arith.constant 2 : index
    %c0_11 = arith.constant 0 : index
    %c0_12 = arith.constant 0 : index
    %10 = vector.load %arg2[%c2, %c0_11, %c0_12] : memref<4x16x128xbf16, #tpu.memory_space<vmem>>, vector<1x16x128xbf16>
    %11 = vector.shape_cast %10 : vector<1x16x128xbf16> to vector<16x128xbf16>
    %c2_13 = arith.constant 2 : index
    %c0_14 = arith.constant 0 : index
    %c0_15 = arith.constant 0 : index
    %12 = vector.load %arg1[%c2_13, %c0_14, %c0_15] : memref<4x128x32xbf16, #tpu.memory_space<vmem>>, vector<1x128x32xbf16>
    %13 = vector.shape_cast %12 : vector<1x128x32xbf16> to vector<128x32xbf16>
    %cst_16 = arith.constant dense<0.000000e+00> : vector<16x32xf32>
    %14 = tpu.matmul %11, %13, %cst_16 {dimension_numbers = #tpu.dot_dimension_numbers<[1], [0], [0], [1], [0, 0, 1, 1], [], []>} : vector<16x128xbf16>, vector<128x32xbf16>, vector<16x32xf32> -> vector<16x32xf32>
    %c3 = arith.constant 3 : index
    %c0_17 = arith.constant 0 : index
    %c0_18 = arith.constant 0 : index
    %15 = vector.load %arg2[%c3, %c0_17, %c0_18] : memref<4x16x128xbf16, #tpu.memory_space<vmem>>, vector<1x16x128xbf16>
    %16 = vector.shape_cast %15 : vector<1x16x128xbf16> to vector<16x128xbf16>
    %c3_19 = arith.constant 3 : index
    %c0_20 = arith.constant 0 : index
    %c0_21 = arith.constant 0 : index
    %17 = vector.load %arg1[%c3_19, %c0_20, %c0_21] : memref<4x128x32xbf16, #tpu.memory_space<vmem>>, vector<1x128x32xbf16>
    %18 = vector.shape_cast %17 : vector<1x128x32xbf16> to vector<128x32xbf16>
    %cst_22 = arith.constant dense<0.000000e+00> : vector<16x32xf32>
    %19 = tpu.matmul %16, %18, %cst_22 {dimension_numbers = #tpu.dot_dimension_numbers<[1], [0], [0], [1], [0, 0, 1, 1], [], []>} : vector<16x128xbf16>, vector<128x32xbf16>, vector<16x32xf32> -> vector<16x32xf32>
    %cst_23 = arith.constant dense<0.000000e+00> : vector<16xf32>
    %20 = vector.multi_reduction <add>, %4, %cst_23 [1] : vector<16x32xf32> to vector<16xf32>
    %21 = vector.shape_cast %20 : vector<16xf32> to vector<16x1xf32>
    %cst_24 = arith.constant 0.000000e+00 : f32
    %22 = vector.broadcast %cst_24 : f32 to vector<16x1xf32>
    %23 = arith.addf %22, %21 : vector<16x1xf32>
    %cst_25 = arith.constant dense<0.000000e+00> : vector<16xf32>
    %24 = vector.multi_reduction <add>, %9, %cst_25 [1] : vector<16x32xf32> to vector<16xf32>
    %25 = vector.shape_cast %24 : vector<16xf32> to vector<16x1xf32>
    %26 = arith.addf %23, %25 : vector<16x1xf32>
    %cst_26 = arith.constant dense<0.000000e+00> : vector<16xf32>
    %27 = vector.multi_reduction <add>, %14, %cst_26 [1] : vector<16x32xf32> to vector<16xf32>
    %28 = vector.shape_cast %27 : vector<16xf32> to vector<16x1xf32>
    %29 = arith.addf %26, %28 : vector<16x1xf32>
    %cst_27 = arith.constant dense<0.000000e+00> : vector<16xf32>
    %30 = vector.multi_reduction <add>, %19, %cst_27 [1] : vector<16x32xf32> to vector<16xf32>
    %31 = vector.shape_cast %30 : vector<16xf32> to vector<16x1xf32>
    %32 = arith.addf %29, %31 : vector<16x1xf32>
    %33 = arith.mulf %4, %4 : vector<16x32xf32>
    %cst_28 = arith.constant dense<0.000000e+00> : vector<16xf32>
    %34 = vector.multi_reduction <add>, %33, %cst_28 [1] : vector<16x32xf32> to vector<16xf32>
    %35 = vector.shape_cast %34 : vector<16xf32> to vector<16x1xf32>
    %cst_29 = arith.constant 0.000000e+00 : f32
    %36 = vector.broadcast %cst_29 : f32 to vector<16x1xf32>
    %37 = arith.addf %36, %35 : vector<16x1xf32>
    %38 = arith.mulf %9, %9 : vector<16x32xf32>
    %cst_30 = arith.constant dense<0.000000e+00> : vector<16xf32>
    %39 = vector.multi_reduction <add>, %38, %cst_30 [1] : vector<16x32xf32> to vector<16xf32>
    %40 = vector.shape_cast %39 : vector<16xf32> to vector<16x1xf32>
    %41 = arith.addf %37, %40 : vector<16x1xf32>
    %42 = arith.mulf %14, %14 : vector<16x32xf32>
    %cst_31 = arith.constant dense<0.000000e+00> : vector<16xf32>
    %43 = vector.multi_reduction <add>, %42, %cst_31 [1] : vector<16x32xf32> to vector<16xf32>
    %44 = vector.shape_cast %43 : vector<16xf32> to vector<16x1xf32>
    %45 = arith.addf %41, %44 : vector<16x1xf32>
    %46 = arith.mulf %19, %19 : vector<16x32xf32>
    %cst_32 = arith.constant dense<0.000000e+00> : vector<16xf32>
    %47 = vector.multi_reduction <add>, %46, %cst_32 [1] : vector<16x32xf32> to vector<16xf32>
    %48 = vector.shape_cast %47 : vector<16xf32> to vector<16x1xf32>
    %49 = arith.addf %45, %48 : vector<16x1xf32>
    %cst_33 = arith.constant 7.812500e-03 : f32
    %50 = vector.broadcast %cst_33 : f32 to vector<16x1xf32>
    %51 = arith.mulf %32, %50 : vector<16x1xf32>
    %cst_34 = arith.constant 7.812500e-03 : f32
    %52 = vector.broadcast %cst_34 : f32 to vector<16x1xf32>
    %53 = arith.mulf %49, %52 : vector<16x1xf32>
    %54 = arith.mulf %51, %51 : vector<16x1xf32>
    %55 = arith.subf %53, %54 : vector<16x1xf32>
    %cst_35 = arith.constant 9.99999974E-6 : f32
    %56 = vector.broadcast %cst_35 : f32 to vector<16x1xf32>
    %57 = arith.addf %55, %56 : vector<16x1xf32>
    %58 = math.rsqrt %57 : vector<16x1xf32>
    %c0_36 = arith.constant 0 : index
    %c0_37 = arith.constant 0 : index
    %59 = vector.load %arg3[%c0_36, %c0_37] : memref<16x1xf32, #tpu.memory_space<vmem>>, vector<16x1xf32>
    %60 = arith.mulf %58, %59 : vector<16x1xf32>
    %c0_38 = arith.constant 0 : index
    %c0_39 = arith.constant 0 : index
    %61 = vector.load %arg4[%c0_38, %c0_39] : memref<16x1xf32, #tpu.memory_space<vmem>>, vector<16x1xf32>
    %62 = arith.mulf %51, %60 : vector<16x1xf32>
    %63 = arith.subf %61, %62 : vector<16x1xf32>
    %64 = vector.broadcast %60 : vector<16x1xf32> to vector<16x32xf32>
    %65 = arith.mulf %4, %64 : vector<16x32xf32>
    %66 = vector.broadcast %63 : vector<16x1xf32> to vector<16x32xf32>
    %67 = arith.addf %65, %66 : vector<16x32xf32>
    %cst_40 = arith.constant 0.000000e+00 : f32
    %68 = vector.broadcast %cst_40 : f32 to vector<16x32xf32>
    %69 = arith.maximumf %67, %68 : vector<16x32xf32>
    %c0_41 = arith.constant 0 : index
    %c0_42 = arith.constant 0 : index
    %c0_43 = arith.constant 0 : index
    %70 = vector.load %arg5[%c0_41, %c0_42, %c0_43] : memref<4x16x32xf32, #tpu.memory_space<vmem>>, vector<1x16x32xf32>
    %71 = vector.shape_cast %70 : vector<1x16x32xf32> to vector<16x32xf32>
    %72 = vector.shape_cast %69 : vector<16x32xf32> to vector<1x16x32xf32>
    tpu.vector_store %arg5[%c0_41, %c0_42, %c0_43], %72 {strides = array<i32>} : memref<4x16x32xf32, #tpu.memory_space<vmem>>, vector<1x16x32xf32>,
    %73 = vector.broadcast %60 : vector<16x1xf32> to vector<16x32xf32>
    %74 = arith.mulf %9, %73 : vector<16x32xf32>
    %75 = vector.broadcast %63 : vector<16x1xf32> to vector<16x32xf32>
    %76 = arith.addf %74, %75 : vector<16x32xf32>
    %cst_44 = arith.constant 0.000000e+00 : f32
    %77 = vector.broadcast %cst_44 : f32 to vector<16x32xf32>
    %78 = arith.maximumf %76, %77 : vector<16x32xf32>
    %c1_45 = arith.constant 1 : index
    %c0_46 = arith.constant 0 : index
    %c0_47 = arith.constant 0 : index
    %79 = vector.load %arg5[%c1_45, %c0_46, %c0_47] : memref<4x16x32xf32, #tpu.memory_space<vmem>>, vector<1x16x32xf32>
    %80 = vector.shape_cast %79 : vector<1x16x32xf32> to vector<16x32xf32>
    %81 = vector.shape_cast %78 : vector<16x32xf32> to vector<1x16x32xf32>
    tpu.vector_store %arg5[%c1_45, %c0_46, %c0_47], %81 {strides = array<i32>} : memref<4x16x32xf32, #tpu.memory_space<vmem>>, vector<1x16x32xf32>,
    %82 = vector.broadcast %60 : vector<16x1xf32> to vector<16x32xf32>
    %83 = arith.mulf %14, %82 : vector<16x32xf32>
    %84 = vector.broadcast %63 : vector<16x1xf32> to vector<16x32xf32>
    %85 = arith.addf %83, %84 : vector<16x32xf32>
    %cst_48 = arith.constant 0.000000e+00 : f32
    %86 = vector.broadcast %cst_48 : f32 to vector<16x32xf32>
    %87 = arith.maximumf %85, %86 : vector<16x32xf32>
    %c2_49 = arith.constant 2 : index
    %c0_50 = arith.constant 0 : index
    %c0_51 = arith.constant 0 : index
    %88 = vector.load %arg5[%c2_49, %c0_50, %c0_51] : memref<4x16x32xf32, #tpu.memory_space<vmem>>, vector<1x16x32xf32>
    %89 = vector.shape_cast %88 : vector<1x16x32xf32> to vector<16x32xf32>
    %90 = vector.shape_cast %87 : vector<16x32xf32> to vector<1x16x32xf32>
    tpu.vector_store %arg5[%c2_49, %c0_50, %c0_51], %90 {strides = array<i32>} : memref<4x16x32xf32, #tpu.memory_space<vmem>>, vector<1x16x32xf32>,
    %91 = vector.broadcast %60 : vector<16x1xf32> to vector<16x32xf32>
    %92 = arith.mulf %19, %91 : vector<16x32xf32>
    %93 = vector.broadcast %63 : vector<16x1xf32> to vector<16x32xf32>
    %94 = arith.addf %92, %93 : vector<16x32xf32>
    %cst_52 = arith.constant 0.000000e+00 : f32
    %95 = vector.broadcast %cst_52 : f32 to vector<16x32xf32>
    %96 = arith.maximumf %94, %95 : vector<16x32xf32>
    %c3_53 = arith.constant 3 : index
    %c0_54 = arith.constant 0 : index
    %c0_55 = arith.constant 0 : index
    %97 = vector.load %arg5[%c3_53, %c0_54, %c0_55] : memref<4x16x32xf32, #tpu.memory_space<vmem>>, vector<1x16x32xf32>
    %98 = vector.shape_cast %97 : vector<1x16x32xf32> to vector<16x32xf32>
    %99 = vector.shape_cast %96 : vector<16x32xf32> to vector<1x16x32xf32>
    tpu.vector_store %arg5[%c3_53, %c0_54, %c0_55], %99 {strides = array<i32>} : memref<4x16x32xf32, #tpu.memory_space<vmem>>, vector<1x16x32xf32>,
    return
  }
  func.func @transform_0(%arg0: i32) -> (i32, i32, i32) {
    %c0_i32 = arith.constant 0 : i32
    %c0_i32_0 = arith.constant 0 : i32
    %c0_i32_1 = arith.constant 0 : i32
    %c0_i32_2 = arith.constant 0 : i32
    return %c0_i32, %c0_i32_0, %c0_i32_1 : i32, i32, i32
  }
  func.func @transform_1(%arg0: i32) -> (i32, i32, i32) {
    %c0_i32 = arith.constant 0 : i32
    %c0_i32_0 = arith.constant 0 : i32
    %c0_i32_1 = arith.constant 0 : i32
    %c0_i32_2 = arith.constant 0 : i32
    return %c0_i32, %c0_i32_0, %c0_i32_1 : i32, i32, i32
  }
  func.func @transform_2(%arg0: i32) -> (i32, i32) {
    %c0_i32 = arith.constant 0 : i32
    %c0_i32_0 = arith.constant 0 : i32
    %c0_i32_1 = arith.constant 0 : i32
    return %c0_i32, %c0_i32_0 : i32, i32
  }
  func.func @transform_3(%arg0: i32) -> (i32, i32) {
    %c0_i32 = arith.constant 0 : i32
    %c0_i32_0 = arith.constant 0 : i32
    %c0_i32_1 = arith.constant 0 : i32
    return %c0_i32, %c0_i32_0 : i32, i32
  }
  func.func @transform_4(%arg0: i32) -> (i32, i32, i32) {
    %c0_i32 = arith.constant 0 : i32
    %c0_i32_0 = arith.constant 0 : i32
    %c0_i32_1 = arith.constant 0 : i32
    %c0_i32_2 = arith.constant 0 : i32
    return %c0_i32, %c0_i32_0, %c0_i32_1 : i32, i32, i32
  }
}

module attributes {stable_mosaic.version = 11 : i64} {
  func.func @_convt4_bn_relu_kernel(%arg0: i32, %arg1: memref<4x64x128xbf16, #tpu.memory_space<vmem>>, %arg2: memref<4x8x64xbf16, #tpu.memory_space<vmem>>, %arg3: memref<8x1xf32, #tpu.memory_space<vmem>>, %arg4: memref<8x1xf32, #tpu.memory_space<vmem>>, %arg5: memref<4x8x128xf32, #tpu.memory_space<vmem>>) attributes {dimension_semantics = [#tpu.dimension_semantics<arbitrary>], iteration_bounds = array<i64: 1>, scalar_prefetch = 0 : i64, scratch_operands = 0 : i64, tpu.core_type = #tpu.core_type<tc>, window_params = [{pipeline_mode = #tpu.pipeline_mode<synchronous>, transform_indices = @transform_0, window_bounds = array<i64: 4, 64, 128>}, {pipeline_mode = #tpu.pipeline_mode<synchronous>, transform_indices = @transform_1, window_bounds = array<i64: 4, 8, 64>}, {pipeline_mode = #tpu.pipeline_mode<synchronous>, transform_indices = @transform_2, window_bounds = array<i64: 8, 1>}, {pipeline_mode = #tpu.pipeline_mode<synchronous>, transform_indices = @transform_3, window_bounds = array<i64: 8, 1>}, {pipeline_mode = #tpu.pipeline_mode<synchronous>, transform_indices = @transform_4, window_bounds = array<i64: 4, 8, 128>}]} {
    %c0 = arith.constant 0 : index
    %c0_0 = arith.constant 0 : index
    %c0_1 = arith.constant 0 : index
    %0 = vector.load %arg2[%c0, %c0_0, %c0_1] : memref<4x8x64xbf16, #tpu.memory_space<vmem>>, vector<1x8x64xbf16>
    %1 = vector.shape_cast %0 : vector<1x8x64xbf16> to vector<8x64xbf16>
    %c0_2 = arith.constant 0 : index
    %c0_3 = arith.constant 0 : index
    %c0_4 = arith.constant 0 : index
    %2 = vector.load %arg1[%c0_2, %c0_3, %c0_4] : memref<4x64x128xbf16, #tpu.memory_space<vmem>>, vector<1x64x128xbf16>
    %3 = vector.shape_cast %2 : vector<1x64x128xbf16> to vector<64x128xbf16>
    %cst = arith.constant dense<0.000000e+00> : vector<8x128xf32>
    %4 = tpu.matmul %1, %3, %cst {dimension_numbers = #tpu.dot_dimension_numbers<[1], [0], [0], [1], [0, 0, 1, 1], [], []>} : vector<8x64xbf16>, vector<64x128xbf16>, vector<8x128xf32> -> vector<8x128xf32>
    %c1 = arith.constant 1 : index
    %c0_5 = arith.constant 0 : index
    %c0_6 = arith.constant 0 : index
    %5 = vector.load %arg2[%c1, %c0_5, %c0_6] : memref<4x8x64xbf16, #tpu.memory_space<vmem>>, vector<1x8x64xbf16>
    %6 = vector.shape_cast %5 : vector<1x8x64xbf16> to vector<8x64xbf16>
    %c1_7 = arith.constant 1 : index
    %c0_8 = arith.constant 0 : index
    %c0_9 = arith.constant 0 : index
    %7 = vector.load %arg1[%c1_7, %c0_8, %c0_9] : memref<4x64x128xbf16, #tpu.memory_space<vmem>>, vector<1x64x128xbf16>
    %8 = vector.shape_cast %7 : vector<1x64x128xbf16> to vector<64x128xbf16>
    %cst_10 = arith.constant dense<0.000000e+00> : vector<8x128xf32>
    %9 = tpu.matmul %6, %8, %cst_10 {dimension_numbers = #tpu.dot_dimension_numbers<[1], [0], [0], [1], [0, 0, 1, 1], [], []>} : vector<8x64xbf16>, vector<64x128xbf16>, vector<8x128xf32> -> vector<8x128xf32>
    %c2 = arith.constant 2 : index
    %c0_11 = arith.constant 0 : index
    %c0_12 = arith.constant 0 : index
    %10 = vector.load %arg2[%c2, %c0_11, %c0_12] : memref<4x8x64xbf16, #tpu.memory_space<vmem>>, vector<1x8x64xbf16>
    %11 = vector.shape_cast %10 : vector<1x8x64xbf16> to vector<8x64xbf16>
    %c2_13 = arith.constant 2 : index
    %c0_14 = arith.constant 0 : index
    %c0_15 = arith.constant 0 : index
    %12 = vector.load %arg1[%c2_13, %c0_14, %c0_15] : memref<4x64x128xbf16, #tpu.memory_space<vmem>>, vector<1x64x128xbf16>
    %13 = vector.shape_cast %12 : vector<1x64x128xbf16> to vector<64x128xbf16>
    %cst_16 = arith.constant dense<0.000000e+00> : vector<8x128xf32>
    %14 = tpu.matmul %11, %13, %cst_16 {dimension_numbers = #tpu.dot_dimension_numbers<[1], [0], [0], [1], [0, 0, 1, 1], [], []>} : vector<8x64xbf16>, vector<64x128xbf16>, vector<8x128xf32> -> vector<8x128xf32>
    %c3 = arith.constant 3 : index
    %c0_17 = arith.constant 0 : index
    %c0_18 = arith.constant 0 : index
    %15 = vector.load %arg2[%c3, %c0_17, %c0_18] : memref<4x8x64xbf16, #tpu.memory_space<vmem>>, vector<1x8x64xbf16>
    %16 = vector.shape_cast %15 : vector<1x8x64xbf16> to vector<8x64xbf16>
    %c3_19 = arith.constant 3 : index
    %c0_20 = arith.constant 0 : index
    %c0_21 = arith.constant 0 : index
    %17 = vector.load %arg1[%c3_19, %c0_20, %c0_21] : memref<4x64x128xbf16, #tpu.memory_space<vmem>>, vector<1x64x128xbf16>
    %18 = vector.shape_cast %17 : vector<1x64x128xbf16> to vector<64x128xbf16>
    %cst_22 = arith.constant dense<0.000000e+00> : vector<8x128xf32>
    %19 = tpu.matmul %16, %18, %cst_22 {dimension_numbers = #tpu.dot_dimension_numbers<[1], [0], [0], [1], [0, 0, 1, 1], [], []>} : vector<8x64xbf16>, vector<64x128xbf16>, vector<8x128xf32> -> vector<8x128xf32>
    %cst_23 = arith.constant dense<0.000000e+00> : vector<8xf32>
    %20 = vector.multi_reduction <add>, %4, %cst_23 [1] : vector<8x128xf32> to vector<8xf32>
    %21 = vector.shape_cast %20 : vector<8xf32> to vector<8x1xf32>
    %cst_24 = arith.constant 0.000000e+00 : f32
    %22 = vector.broadcast %cst_24 : f32 to vector<8x1xf32>
    %23 = arith.addf %22, %21 : vector<8x1xf32>
    %cst_25 = arith.constant dense<0.000000e+00> : vector<8xf32>
    %24 = vector.multi_reduction <add>, %9, %cst_25 [1] : vector<8x128xf32> to vector<8xf32>
    %25 = vector.shape_cast %24 : vector<8xf32> to vector<8x1xf32>
    %26 = arith.addf %23, %25 : vector<8x1xf32>
    %cst_26 = arith.constant dense<0.000000e+00> : vector<8xf32>
    %27 = vector.multi_reduction <add>, %14, %cst_26 [1] : vector<8x128xf32> to vector<8xf32>
    %28 = vector.shape_cast %27 : vector<8xf32> to vector<8x1xf32>
    %29 = arith.addf %26, %28 : vector<8x1xf32>
    %cst_27 = arith.constant dense<0.000000e+00> : vector<8xf32>
    %30 = vector.multi_reduction <add>, %19, %cst_27 [1] : vector<8x128xf32> to vector<8xf32>
    %31 = vector.shape_cast %30 : vector<8xf32> to vector<8x1xf32>
    %32 = arith.addf %29, %31 : vector<8x1xf32>
    %33 = arith.mulf %4, %4 : vector<8x128xf32>
    %cst_28 = arith.constant dense<0.000000e+00> : vector<8xf32>
    %34 = vector.multi_reduction <add>, %33, %cst_28 [1] : vector<8x128xf32> to vector<8xf32>
    %35 = vector.shape_cast %34 : vector<8xf32> to vector<8x1xf32>
    %cst_29 = arith.constant 0.000000e+00 : f32
    %36 = vector.broadcast %cst_29 : f32 to vector<8x1xf32>
    %37 = arith.addf %36, %35 : vector<8x1xf32>
    %38 = arith.mulf %9, %9 : vector<8x128xf32>
    %cst_30 = arith.constant dense<0.000000e+00> : vector<8xf32>
    %39 = vector.multi_reduction <add>, %38, %cst_30 [1] : vector<8x128xf32> to vector<8xf32>
    %40 = vector.shape_cast %39 : vector<8xf32> to vector<8x1xf32>
    %41 = arith.addf %37, %40 : vector<8x1xf32>
    %42 = arith.mulf %14, %14 : vector<8x128xf32>
    %cst_31 = arith.constant dense<0.000000e+00> : vector<8xf32>
    %43 = vector.multi_reduction <add>, %42, %cst_31 [1] : vector<8x128xf32> to vector<8xf32>
    %44 = vector.shape_cast %43 : vector<8xf32> to vector<8x1xf32>
    %45 = arith.addf %41, %44 : vector<8x1xf32>
    %46 = arith.mulf %19, %19 : vector<8x128xf32>
    %cst_32 = arith.constant dense<0.000000e+00> : vector<8xf32>
    %47 = vector.multi_reduction <add>, %46, %cst_32 [1] : vector<8x128xf32> to vector<8xf32>
    %48 = vector.shape_cast %47 : vector<8xf32> to vector<8x1xf32>
    %49 = arith.addf %45, %48 : vector<8x1xf32>
    %cst_33 = arith.constant 0.001953125 : f32
    %50 = vector.broadcast %cst_33 : f32 to vector<8x1xf32>
    %51 = arith.mulf %32, %50 : vector<8x1xf32>
    %cst_34 = arith.constant 0.001953125 : f32
    %52 = vector.broadcast %cst_34 : f32 to vector<8x1xf32>
    %53 = arith.mulf %49, %52 : vector<8x1xf32>
    %54 = arith.mulf %51, %51 : vector<8x1xf32>
    %55 = arith.subf %53, %54 : vector<8x1xf32>
    %cst_35 = arith.constant 9.99999974E-6 : f32
    %56 = vector.broadcast %cst_35 : f32 to vector<8x1xf32>
    %57 = arith.addf %55, %56 : vector<8x1xf32>
    %58 = math.rsqrt %57 : vector<8x1xf32>
    %c0_36 = arith.constant 0 : index
    %c0_37 = arith.constant 0 : index
    %59 = vector.load %arg3[%c0_36, %c0_37] : memref<8x1xf32, #tpu.memory_space<vmem>>, vector<8x1xf32>
    %60 = arith.mulf %58, %59 : vector<8x1xf32>
    %c0_38 = arith.constant 0 : index
    %c0_39 = arith.constant 0 : index
    %61 = vector.load %arg4[%c0_38, %c0_39] : memref<8x1xf32, #tpu.memory_space<vmem>>, vector<8x1xf32>
    %62 = arith.mulf %51, %60 : vector<8x1xf32>
    %63 = arith.subf %61, %62 : vector<8x1xf32>
    %64 = vector.broadcast %60 : vector<8x1xf32> to vector<8x128xf32>
    %65 = arith.mulf %4, %64 : vector<8x128xf32>
    %66 = vector.broadcast %63 : vector<8x1xf32> to vector<8x128xf32>
    %67 = arith.addf %65, %66 : vector<8x128xf32>
    %cst_40 = arith.constant 0.000000e+00 : f32
    %68 = vector.broadcast %cst_40 : f32 to vector<8x128xf32>
    %69 = arith.maximumf %67, %68 : vector<8x128xf32>
    %c0_41 = arith.constant 0 : index
    %c0_42 = arith.constant 0 : index
    %c0_43 = arith.constant 0 : index
    %70 = vector.load %arg5[%c0_41, %c0_42, %c0_43] : memref<4x8x128xf32, #tpu.memory_space<vmem>>, vector<1x8x128xf32>
    %71 = vector.shape_cast %70 : vector<1x8x128xf32> to vector<8x128xf32>
    %72 = vector.shape_cast %69 : vector<8x128xf32> to vector<1x8x128xf32>
    tpu.vector_store %arg5[%c0_41, %c0_42, %c0_43], %72 {strides = array<i32>} : memref<4x8x128xf32, #tpu.memory_space<vmem>>, vector<1x8x128xf32>,
    %73 = vector.broadcast %60 : vector<8x1xf32> to vector<8x128xf32>
    %74 = arith.mulf %9, %73 : vector<8x128xf32>
    %75 = vector.broadcast %63 : vector<8x1xf32> to vector<8x128xf32>
    %76 = arith.addf %74, %75 : vector<8x128xf32>
    %cst_44 = arith.constant 0.000000e+00 : f32
    %77 = vector.broadcast %cst_44 : f32 to vector<8x128xf32>
    %78 = arith.maximumf %76, %77 : vector<8x128xf32>
    %c1_45 = arith.constant 1 : index
    %c0_46 = arith.constant 0 : index
    %c0_47 = arith.constant 0 : index
    %79 = vector.load %arg5[%c1_45, %c0_46, %c0_47] : memref<4x8x128xf32, #tpu.memory_space<vmem>>, vector<1x8x128xf32>
    %80 = vector.shape_cast %79 : vector<1x8x128xf32> to vector<8x128xf32>
    %81 = vector.shape_cast %78 : vector<8x128xf32> to vector<1x8x128xf32>
    tpu.vector_store %arg5[%c1_45, %c0_46, %c0_47], %81 {strides = array<i32>} : memref<4x8x128xf32, #tpu.memory_space<vmem>>, vector<1x8x128xf32>,
    %82 = vector.broadcast %60 : vector<8x1xf32> to vector<8x128xf32>
    %83 = arith.mulf %14, %82 : vector<8x128xf32>
    %84 = vector.broadcast %63 : vector<8x1xf32> to vector<8x128xf32>
    %85 = arith.addf %83, %84 : vector<8x128xf32>
    %cst_48 = arith.constant 0.000000e+00 : f32
    %86 = vector.broadcast %cst_48 : f32 to vector<8x128xf32>
    %87 = arith.maximumf %85, %86 : vector<8x128xf32>
    %c2_49 = arith.constant 2 : index
    %c0_50 = arith.constant 0 : index
    %c0_51 = arith.constant 0 : index
    %88 = vector.load %arg5[%c2_49, %c0_50, %c0_51] : memref<4x8x128xf32, #tpu.memory_space<vmem>>, vector<1x8x128xf32>
    %89 = vector.shape_cast %88 : vector<1x8x128xf32> to vector<8x128xf32>
    %90 = vector.shape_cast %87 : vector<8x128xf32> to vector<1x8x128xf32>
    tpu.vector_store %arg5[%c2_49, %c0_50, %c0_51], %90 {strides = array<i32>} : memref<4x8x128xf32, #tpu.memory_space<vmem>>, vector<1x8x128xf32>,
    %91 = vector.broadcast %60 : vector<8x1xf32> to vector<8x128xf32>
    %92 = arith.mulf %19, %91 : vector<8x128xf32>
    %93 = vector.broadcast %63 : vector<8x1xf32> to vector<8x128xf32>
    %94 = arith.addf %92, %93 : vector<8x128xf32>
    %cst_52 = arith.constant 0.000000e+00 : f32
    %95 = vector.broadcast %cst_52 : f32 to vector<8x128xf32>
    %96 = arith.maximumf %94, %95 : vector<8x128xf32>
    %c3_53 = arith.constant 3 : index
    %c0_54 = arith.constant 0 : index
    %c0_55 = arith.constant 0 : index
    %97 = vector.load %arg5[%c3_53, %c0_54, %c0_55] : memref<4x8x128xf32, #tpu.memory_space<vmem>>, vector<1x8x128xf32>
    %98 = vector.shape_cast %97 : vector<1x8x128xf32> to vector<8x128xf32>
    %99 = vector.shape_cast %96 : vector<8x128xf32> to vector<1x8x128xf32>
    tpu.vector_store %arg5[%c3_53, %c0_54, %c0_55], %99 {strides = array<i32>} : memref<4x8x128xf32, #tpu.memory_space<vmem>>, vector<1x8x128xf32>,
    return
  }
  func.func @transform_0(%arg0: i32) -> (i32, i32, i32) {
    %c0_i32 = arith.constant 0 : i32
    %c0_i32_0 = arith.constant 0 : i32
    %c0_i32_1 = arith.constant 0 : i32
    %c0_i32_2 = arith.constant 0 : i32
    return %c0_i32, %c0_i32_0, %c0_i32_1 : i32, i32, i32
  }
  func.func @transform_1(%arg0: i32) -> (i32, i32, i32) {
    %c0_i32 = arith.constant 0 : i32
    %c0_i32_0 = arith.constant 0 : i32
    %c0_i32_1 = arith.constant 0 : i32
    %c0_i32_2 = arith.constant 0 : i32
    return %c0_i32, %c0_i32_0, %c0_i32_1 : i32, i32, i32
  }
  func.func @transform_2(%arg0: i32) -> (i32, i32) {
    %c0_i32 = arith.constant 0 : i32
    %c0_i32_0 = arith.constant 0 : i32
    %c0_i32_1 = arith.constant 0 : i32
    return %c0_i32, %c0_i32_0 : i32, i32
  }
  func.func @transform_3(%arg0: i32) -> (i32, i32) {
    %c0_i32 = arith.constant 0 : i32
    %c0_i32_0 = arith.constant 0 : i32
    %c0_i32_1 = arith.constant 0 : i32
    return %c0_i32, %c0_i32_0 : i32, i32
  }
  func.func @transform_4(%arg0: i32) -> (i32, i32, i32) {
    %c0_i32 = arith.constant 0 : i32
    %c0_i32_0 = arith.constant 0 : i32
    %c0_i32_1 = arith.constant 0 : i32
    %c0_i32_2 = arith.constant 0 : i32
    return %c0_i32, %c0_i32_0, %c0_i32_1 : i32, i32, i32
  }
}

module attributes {stable_mosaic.version = 11 : i64} {
  func.func @_convt4_tanh_kernel(%arg0: i32, %arg1: memref<4x32x512xbf16, #tpu.memory_space<vmem>>, %arg2: memref<4x3x32xbf16, #tpu.memory_space<vmem>>, %arg3: memref<4x3x512xf32, #tpu.memory_space<vmem>>) attributes {dimension_semantics = [#tpu.dimension_semantics<arbitrary>], iteration_bounds = array<i64: 1>, scalar_prefetch = 0 : i64, scratch_operands = 0 : i64, tpu.core_type = #tpu.core_type<tc>, window_params = [{pipeline_mode = #tpu.pipeline_mode<synchronous>, transform_indices = @transform_0, window_bounds = array<i64: 4, 32, 512>}, {pipeline_mode = #tpu.pipeline_mode<synchronous>, transform_indices = @transform_1, window_bounds = array<i64: 4, 3, 32>}, {pipeline_mode = #tpu.pipeline_mode<synchronous>, transform_indices = @transform_2, window_bounds = array<i64: 4, 3, 512>}]} {
    %c0 = arith.constant 0 : index
    %c0_0 = arith.constant 0 : index
    %c0_1 = arith.constant 0 : index
    %0 = vector.load %arg2[%c0, %c0_0, %c0_1] : memref<4x3x32xbf16, #tpu.memory_space<vmem>>, vector<1x3x32xbf16>
    %1 = vector.shape_cast %0 : vector<1x3x32xbf16> to vector<3x32xbf16>
    %c0_2 = arith.constant 0 : index
    %c0_3 = arith.constant 0 : index
    %c0_4 = arith.constant 0 : index
    %2 = vector.load %arg1[%c0_2, %c0_3, %c0_4] : memref<4x32x512xbf16, #tpu.memory_space<vmem>>, vector<1x32x512xbf16>
    %3 = vector.shape_cast %2 : vector<1x32x512xbf16> to vector<32x512xbf16>
    %cst = arith.constant dense<0.000000e+00> : vector<3x512xf32>
    %4 = tpu.matmul %1, %3, %cst {dimension_numbers = #tpu.dot_dimension_numbers<[1], [0], [0], [1], [0, 0, 1, 1], [], []>} : vector<3x32xbf16>, vector<32x512xbf16>, vector<3x512xf32> -> vector<3x512xf32>
    %5 = math.tanh %4 : vector<3x512xf32>
    %c0_5 = arith.constant 0 : index
    %c0_6 = arith.constant 0 : index
    %c0_7 = arith.constant 0 : index
    %6 = vector.load %arg3[%c0_5, %c0_6, %c0_7] : memref<4x3x512xf32, #tpu.memory_space<vmem>>, vector<1x3x512xf32>
    %7 = vector.shape_cast %6 : vector<1x3x512xf32> to vector<3x512xf32>
    %8 = vector.shape_cast %5 : vector<3x512xf32> to vector<1x3x512xf32>
    tpu.vector_store %arg3[%c0_5, %c0_6, %c0_7], %8 {strides = array<i32>} : memref<4x3x512xf32, #tpu.memory_space<vmem>>, vector<1x3x512xf32>,
    %c1 = arith.constant 1 : index
    %c0_8 = arith.constant 0 : index
    %c0_9 = arith.constant 0 : index
    %9 = vector.load %arg2[%c1, %c0_8, %c0_9] : memref<4x3x32xbf16, #tpu.memory_space<vmem>>, vector<1x3x32xbf16>
    %10 = vector.shape_cast %9 : vector<1x3x32xbf16> to vector<3x32xbf16>
    %c1_10 = arith.constant 1 : index
    %c0_11 = arith.constant 0 : index
    %c0_12 = arith.constant 0 : index
    %11 = vector.load %arg1[%c1_10, %c0_11, %c0_12] : memref<4x32x512xbf16, #tpu.memory_space<vmem>>, vector<1x32x512xbf16>
    %12 = vector.shape_cast %11 : vector<1x32x512xbf16> to vector<32x512xbf16>
    %cst_13 = arith.constant dense<0.000000e+00> : vector<3x512xf32>
    %13 = tpu.matmul %10, %12, %cst_13 {dimension_numbers = #tpu.dot_dimension_numbers<[1], [0], [0], [1], [0, 0, 1, 1], [], []>} : vector<3x32xbf16>, vector<32x512xbf16>, vector<3x512xf32> -> vector<3x512xf32>
    %14 = math.tanh %13 : vector<3x512xf32>
    %c1_14 = arith.constant 1 : index
    %c0_15 = arith.constant 0 : index
    %c0_16 = arith.constant 0 : index
    %15 = vector.load %arg3[%c1_14, %c0_15, %c0_16] : memref<4x3x512xf32, #tpu.memory_space<vmem>>, vector<1x3x512xf32>
    %16 = vector.shape_cast %15 : vector<1x3x512xf32> to vector<3x512xf32>
    %17 = vector.shape_cast %14 : vector<3x512xf32> to vector<1x3x512xf32>
    tpu.vector_store %arg3[%c1_14, %c0_15, %c0_16], %17 {strides = array<i32>} : memref<4x3x512xf32, #tpu.memory_space<vmem>>, vector<1x3x512xf32>,
    %c2 = arith.constant 2 : index
    %c0_17 = arith.constant 0 : index
    %c0_18 = arith.constant 0 : index
    %18 = vector.load %arg2[%c2, %c0_17, %c0_18] : memref<4x3x32xbf16, #tpu.memory_space<vmem>>, vector<1x3x32xbf16>
    %19 = vector.shape_cast %18 : vector<1x3x32xbf16> to vector<3x32xbf16>
    %c2_19 = arith.constant 2 : index
    %c0_20 = arith.constant 0 : index
    %c0_21 = arith.constant 0 : index
    %20 = vector.load %arg1[%c2_19, %c0_20, %c0_21] : memref<4x32x512xbf16, #tpu.memory_space<vmem>>, vector<1x32x512xbf16>
    %21 = vector.shape_cast %20 : vector<1x32x512xbf16> to vector<32x512xbf16>
    %cst_22 = arith.constant dense<0.000000e+00> : vector<3x512xf32>
    %22 = tpu.matmul %19, %21, %cst_22 {dimension_numbers = #tpu.dot_dimension_numbers<[1], [0], [0], [1], [0, 0, 1, 1], [], []>} : vector<3x32xbf16>, vector<32x512xbf16>, vector<3x512xf32> -> vector<3x512xf32>
    %23 = math.tanh %22 : vector<3x512xf32>
    %c2_23 = arith.constant 2 : index
    %c0_24 = arith.constant 0 : index
    %c0_25 = arith.constant 0 : index
    %24 = vector.load %arg3[%c2_23, %c0_24, %c0_25] : memref<4x3x512xf32, #tpu.memory_space<vmem>>, vector<1x3x512xf32>
    %25 = vector.shape_cast %24 : vector<1x3x512xf32> to vector<3x512xf32>
    %26 = vector.shape_cast %23 : vector<3x512xf32> to vector<1x3x512xf32>
    tpu.vector_store %arg3[%c2_23, %c0_24, %c0_25], %26 {strides = array<i32>} : memref<4x3x512xf32, #tpu.memory_space<vmem>>, vector<1x3x512xf32>,
    %c3 = arith.constant 3 : index
    %c0_26 = arith.constant 0 : index
    %c0_27 = arith.constant 0 : index
    %27 = vector.load %arg2[%c3, %c0_26, %c0_27] : memref<4x3x32xbf16, #tpu.memory_space<vmem>>, vector<1x3x32xbf16>
    %28 = vector.shape_cast %27 : vector<1x3x32xbf16> to vector<3x32xbf16>
    %c3_28 = arith.constant 3 : index
    %c0_29 = arith.constant 0 : index
    %c0_30 = arith.constant 0 : index
    %29 = vector.load %arg1[%c3_28, %c0_29, %c0_30] : memref<4x32x512xbf16, #tpu.memory_space<vmem>>, vector<1x32x512xbf16>
    %30 = vector.shape_cast %29 : vector<1x32x512xbf16> to vector<32x512xbf16>
    %cst_31 = arith.constant dense<0.000000e+00> : vector<3x512xf32>
    %31 = tpu.matmul %28, %30, %cst_31 {dimension_numbers = #tpu.dot_dimension_numbers<[1], [0], [0], [1], [0, 0, 1, 1], [], []>} : vector<3x32xbf16>, vector<32x512xbf16>, vector<3x512xf32> -> vector<3x512xf32>
    %32 = math.tanh %31 : vector<3x512xf32>
    %c3_32 = arith.constant 3 : index
    %c0_33 = arith.constant 0 : index
    %c0_34 = arith.constant 0 : index
    %33 = vector.load %arg3[%c3_32, %c0_33, %c0_34] : memref<4x3x512xf32, #tpu.memory_space<vmem>>, vector<1x3x512xf32>
    %34 = vector.shape_cast %33 : vector<1x3x512xf32> to vector<3x512xf32>
    %35 = vector.shape_cast %32 : vector<3x512xf32> to vector<1x3x512xf32>
    tpu.vector_store %arg3[%c3_32, %c0_33, %c0_34], %35 {strides = array<i32>} : memref<4x3x512xf32, #tpu.memory_space<vmem>>, vector<1x3x512xf32>,
    return
  }
  func.func @transform_0(%arg0: i32) -> (i32, i32, i32) {
    %c0_i32 = arith.constant 0 : i32
    %c0_i32_0 = arith.constant 0 : i32
    %c0_i32_1 = arith.constant 0 : i32
    %c0_i32_2 = arith.constant 0 : i32
    return %c0_i32, %c0_i32_0, %c0_i32_1 : i32, i32, i32
  }
  func.func @transform_1(%arg0: i32) -> (i32, i32, i32) {
    %c0_i32 = arith.constant 0 : i32
    %c0_i32_0 = arith.constant 0 : i32
    %c0_i32_1 = arith.constant 0 : i32
    %c0_i32_2 = arith.constant 0 : i32
    return %c0_i32, %c0_i32_0, %c0_i32_1 : i32, i32, i32
  }
  func.func @transform_2(%arg0: i32) -> (i32, i32, i32) {
    %c0_i32 = arith.constant 0 : i32
    %c0_i32_0 = arith.constant 0 : i32
    %c0_i32_1 = arith.constant 0 : i32
    %c0_i32_2 = arith.constant 0 : i32
    return %c0_i32, %c0_i32_0, %c0_i32_1 : i32, i32, i32
  }
}

</mosaic_0001>

<bundles_post_ra>
// kernel: generator_forward.5
= control target key start
LH: loop header
LB: loop body
LE: loop exit
PB: predicated region body
PF: predicated region fallthrough
CT: control target
= control target key end

     0   :  { %8 = vsyncpa [#allocation3], 0  ;;  %s231_s0 = inlined_call_operand.vmem [shape: bf16[2,16], index: 0, kind: input, shape index: {}]   ;;  %s232_s1 = inlined_call_operand.hbm [shape: bf16[16,16], index: 1, kind: input, shape index: {}]   ;;  %s233_s2 = inlined_call_operand.hbm [shape: f32[1,16], index: 2, kind: input, shape index: {}]   ;;  %s234_s3 = inlined_call_operand.vmem [shape: f32[2,16], index: 3, kind: output, shape index: {}]  }
   0x1   :  { %9 = vsyncpa [#allocation5], 0  ;;  %s175_s12 = smov [#allocation2]   ;;  %s127_s16 = scalar_lea.hbm %s232_s1, 128 }
   0x2   :  { %s17_s13 = sshll.u32 %s175_s12, 4  ;;  %p128_p0 = scmp.ne.s32.totalorder %s232_s1, %s127_s16  ;;  %s18_s13 = int_to_ptr.vmem [resolvable:$true] %s17_s13 }
   0x3   :  { %p131_p1 = scmp.lt.u32.totalorder %s127_s16, %s232_s1 }
   0x5   :  { %p133_p2 = pnand %p131_p1, %p128_p0 }
   0x7   :  { %136 = shalt.err (!%p133_p2)
}
   0x8   :  { %s137_s21 = scalar_lea.vmem %s18_s13, 128  ;;  %p142_p4 = scmp.lt.s32.totalorder %s18_s13, %s18_s13 }
   0x9   :  { %p138_p3 = scmp.ne.s32.totalorder %s18_s13, %s137_s21  ;;  %p143_p5 = scmp.lt.s32.totalorder %s137_s21, %s137_s21 }
   0xb   :  { %p144_p6 = por %p143_p5, %p142_p4 }
   0xd   :  { %p145_p7 = pnand %p144_p6, %p138_p3 }
   0xf   :  { %148 = shalt.err (!%p145_p7)
}
  0x10   :  { %s176_s22 = smov 64   ;;  %s177_s23 = smov 4  }
  0x11   :  { %23 = dma.hbm_to_vmem [thread:$0]  %s232_s1, 128, %s18_s13, [#allocation3], %s176_s22, %s176_s22, %s177_s23  }
  0x12   :  { %s178_s26 = smov [#allocation4]   ;;  %s149_s30 = scalar_lea.hbm %s233_s2, 16 }
  0x13   :  { %s30_s27 = sshll.u32 %s178_s26, 4  ;;  %p150_p8 = scmp.ne.s32.totalorder %s233_s2, %s149_s30  ;;  %s31_s27 = int_to_ptr.vmem [resolvable:$true] %s30_s27 }
  0x14   :  { %p153_p9 = scmp.lt.u32.totalorder %s149_s30, %s233_s2 }
  0x16   :  { %p155_p10 = pnand %p153_p9, %p150_p8 }
  0x18   :  { %158 = shalt.err (!%p155_p10)
}
  0x19   :  { %s159_s8 = scalar_lea.vmem %s31_s27, 16  ;;  %s163_s1 = scalar_lea.vmem %s31_s27, 32 }
  0x1a   :  { %p160_p11 = scmp.ne.s32.totalorder %s31_s27, %s159_s8  ;;  %p164_p12 = scmp.lt.s32.totalorder %s31_s27, %s31_s27 }
  0x1b   :  { %p165_p13 = scmp.lt.s32.totalorder %s163_s1, %s159_s8 }
  0x1d   :  { %p166_p0 = por %p165_p13, %p164_p12 }
  0x1f   :  { %p167_p1 = pnand %p166_p0, %p160_p11 }
  0x21   :  { %170 = shalt.err (!%p167_p1)
}
  0x22   :  { %33 = dma.hbm_to_vmem [thread:$0]  %s233_s2, 16, %s31_s27, [#allocation5]  }
  0x23   :  { %171 = dma.done.wait [#allocation3], 128  }
  0x24   :  { %172 = vsyncadd [#allocation3], 4294967168 }
  0x25   :  { %173 = dma.done.wait [#allocation5], 16  }
  0x26   :  { %174 = vsyncadd [#allocation5], 4294967280  ;;  %v179_v0 = vmov 0.0   ;;  %vm180_vm0 = vmmov 0   ;;  %v126_v1 = vld [vmem:[#allocation2] sm:$0xff]   ;;  %vm57_vm1 = vcmask 130048  }
  0x27   :  { %114 = vmatprep.subr.bf16.mxu0 %v179_v0  ;;  %116 = vmatprep.mubr.msk.bf16.mxu0 %vm180_vm0, %v179_v0  ;;  %v41_v2 = vld [vmem:[%s231_s0] sm:$0x1]  ;;  %v109_v3 = vld [vmem:[#allocation4] ss:$0 sm:$0xff]  ;;  %vm101_vm2 = vcmask 123904  }
  0x28   :  { %115 = vmatpush3.bf16.msra.mxu0 %v126_v1 }
  0x2b   :  { %117 = vmatmul.mubr.msk.bf16.vlgmr.msra.gmra.mrb[0].mxu0 %vm57_vm1, %v41_v2 }
  0xfe   :  { %v95_v4 = vpop.f32.mrb[0].mxu0 }
  0xff   :  { %v96_v5 = vadd.f32 %v109_v3, %v95_v4  ;;  %v118_v6 = vpop.f32.mrb[1].mxu0 }
 0x100   :  { %v98_v7 = vpop.f32.mrb[2].mxu0 }
 0x101   :  { %102 = vst.msk [vmem:[%s234_s3] sm:$0x3] %vm101_vm2, %v96_v5  ;;  %v119_v8 = vpop.f32.mrb[3].mxu0 }
 0x102   :  { %107 = vsyncpa [#allocation3], 1 }
 0x103   :  { %108 = vsyncpa [#allocation5], 1 }

// kernel: generator_forward.6
= control target key start
LH: loop header
LB: loop body
LE: loop exit
PB: predicated region body
PF: predicated region fallthrough
CT: control target
= control target key end

     0   :  { %vm40_vm0 = vcmask 130048   ;;  %vm333_vm1 = vcmask 64512   ;;  %s1028_s0 = inlined_call_operand.vmem [shape: bf16[4,16,8], index: 0, kind: input, shape index: {}]   ;;  %s1029_s1 = inlined_call_operand.vmem [shape: bf16[4,32,16], index: 1, kind: input, shape index: {}]   ;;  %s1030_s2 = inlined_call_operand.vmem [shape: f32[32,1], index: 2, kind: input, shape index: {}]   ;;  %s1031_s3 = inlined_call_operand.vmem [shape: f32[32,1], index: 3, kind: input, shape index: {}]   ;;  %s1032_s4 = inlined_call_operand.vmem [shape: f32[4,32,8], index: 4, kind: output, shape index: {}]  }
   0x1   :  { %v722_v0 = vld [vmem:[%s1028_s0] sm:$0xff]   ;;  %v723_v1 = vld [vmem:[%s1028_s0 + $0x8] sm:$0xff]   ;;  %v725_v3 = vld [vmem:[%s1029_s1 + $0x10] sm:$0xff]  }
   0x2   :  { %695 = vmatprep.subr.bf16.mxu0 %v722_v0  ;;  %v724_v2 = vld [vmem:[%s1029_s1] sm:$0xff]   ;;  %701 = vmatprep.subr.bf16.mxu1 %v723_v1  ;;  %v726_v4 = vld [vmem:[%s1029_s1 + $0x8] sm:$0xff]   ;;  %v727_v5 = vld [vmem:[%s1029_s1 + $0x18] sm:$0xff]  }
   0x3   :  { %696 = vmatpush3.bf16.msra.mxu0 %v722_v0  ;;  %702 = vmatpush3.bf16.msra.mxu1 %v723_v1  ;;  %v728_v6 = vld [vmem:[%s1028_s0 + $0x10] sm:$0xff]   ;;  %v729_v7 = vld [vmem:[%s1028_s0 + $0x18] sm:$0xff]   ;;  %v730_v8 = vld [vmem:[%s1029_s1 + $0x20] sm:$0xff]  }
   0x4   :  { %697 = vmatprep.mubr.msk.bf16.mxu0 %vm40_vm0, %v724_v2  ;;  %703 = vmatprep.mubr.msk.bf16.mxu1 %vm40_vm0, %v725_v3  ;;  %v731_v9 = vld [vmem:[%s1029_s1 + $0x28] sm:$0xff]   ;;  %v732_v10 = vld [vmem:[%s1029_s1 + $0x30] sm:$0xff]   ;;  %v733_v11 = vld [vmem:[%s1029_s1 + $0x38] sm:$0xff]  }
   0x5   :  { %707 = vmatprep.subr.bf16.mxu0 %v728_v6  ;;  %713 = vmatprep.subr.bf16.mxu1 %v729_v7 }
   0x6   :  { %698 = vmatmul.mubr.msk.bf16.vlgmr.msra.gmra.mrb[0].mxu0 %vm40_vm0, %v726_v4  ;;  %704 = vmatmul.mubr.msk.bf16.vlgmr.msra.gmra.mrb[0].mxu1 %vm40_vm0, %v727_v5 }
   0x7   :  { %708 = vmatpush3.bf16.msra.mxu0 %v728_v6  ;;  %709 = vmatprep.mubr.msk.bf16.mxu0 %vm40_vm0, %v730_v8 }
   0x8   :  { %714 = vmatpush3.bf16.msra.mxu1 %v729_v7  ;;  %715 = vmatprep.mubr.msk.bf16.mxu1 %vm40_vm0, %v732_v10 }
   0xe   :  { %710 = vmatmul.mubr.msk.bf16.vlgmr.msra.gmra.mrb[4].mxu0 %vm40_vm0, %v731_v9  ;;  %716 = vmatmul.mubr.msk.bf16.vlgmr.msra.gmra.mrb[4].mxu1 %vm40_vm0, %v733_v11 }
  0xd9   :  { %v812_v12 = vpop.f32.mrb[0].mxu0  ;;  %v814_v13 = vpop.f32.mrb[0].mxu1 }
  0xda   :  { %v816_v14 = vpop.f32.mrb[1].mxu0  ;;  %v340_v15 = vsel %vm333_vm1, %v812_v12, 0.0  ;;  %v820_v16 = vpop.f32.mrb[1].mxu1  ;;  %v356_v17 = vsel %vm333_vm1, %v814_v13, 0.0  ;;  %v400_v29 = vmul.f32 %v812_v12, %v812_v12  ;;  %v420_v38 = vmul.f32 %v814_v13, %v814_v13 }
  0xdb   :  { %341 = vadd.xlane.f32.xlu1 %v340_v15  ;;  %v824_v18 = vpop.f32.mrb[2].mxu0  ;;  %357 = vadd.xlane.f32.xlu0 %v356_v17  ;;  %v826_v19 = vpop.f32.mrb[2].mxu1  ;;  %v334_v23 = vsel %vm333_vm1, %v816_v14, 0.0  ;;  %v350_v28 = vsel %vm333_vm1, %v820_v16, 0.0  ;;  %v398_v45 = vmul.f32 %v816_v14, %v816_v14  ;;  %v418_v49 = vmul.f32 %v820_v16, %v820_v16 }
  0xdc   :  { %v828_v20 = vpop.f32.mrb[3].mxu0  ;;  %v343_v21 = vsel %vm333_vm1, %v824_v18, 0.0  ;;  %v832_v22 = vpop.f32.mrb[3].mxu1  ;;  %v359_v25 = vsel %vm333_vm1, %v826_v19, 0.0  ;;  %v401_v36 = vmul.f32 %v824_v18, %v824_v18  ;;  %v408_v37 = vsel %vm333_vm1, %v400_v29, 0.0 }
  0xdd   :  { %v353_v35 = vsel %vm333_vm1, %v832_v22, 0.0  ;;  %v421_v40 = vmul.f32 %v826_v19, %v826_v19  ;;  %v428_v41 = vsel %vm333_vm1, %v420_v38, 0.0  ;;  %v399_v43 = vmul.f32 %v828_v20, %v828_v20 }
  0xde   :  { %v411_v39 = vsel %vm333_vm1, %v401_v36, 0.0  ;;  %v337_v44 = vsel %vm333_vm1, %v828_v20, 0.0  ;;  %v419_v47 = vmul.f32 %v832_v22, %v832_v22  ;;  %v402_v48 = vsel %vm333_vm1, %v398_v45, 0.0 }
  0xdf   :  { %344 = vadd.xlane.f32.xlu1 %v343_v21  ;;  %335 = vadd.xlane.f32.xlu0 %v334_v23  ;;  %v431_v42 = vsel %vm333_vm1, %v421_v40, 0.0  ;;  %v405_v46 = vsel %vm333_vm1, %v399_v43, 0.0  ;;  %v422_v51 = vsel %vm333_vm1, %v418_v49, 0.0  ;;  %v742_v15 = vmov 0  }
  0xe0   :  { %v425_v50 = vsel %vm333_vm1, %v419_v47, 0.0  ;;  %720 = vset.pattern.permute.xlu0 %v742_v15  ;;  %721 = vset.pattern.permute.xlu1 %v742_v15 }
  0xe1   :  { %v836_v24 = vpop.f32.mrb[4].mxu0  ;;  %v842_v27 = vpop.f32.mrb[4].mxu1 }
  0xe2   :  { %v840_v26 = vpop.f32.mrb[5].mxu0  ;;  %v850_v31 = vpop.f32.mrb[5].mxu1  ;;  %v372_v53 = vsel %vm333_vm1, %v836_v24, 0.0  ;;  %v388_v55 = vsel %vm333_vm1, %v842_v27, 0.0  ;;  %v440_v61 = vmul.f32 %v836_v24, %v836_v24  ;;  %v460_v9 = vmul.f32 %v842_v27, %v842_v27 }
  0xe3   :  { %360 = vadd.xlane.f32.xlu1 %v359_v25  ;;  %v848_v30 = vpop.f32.mrb[6].mxu0  ;;  %351 = vadd.xlane.f32.xlu0 %v350_v28  ;;  %v854_v33 = vpop.f32.mrb[6].mxu1  ;;  %v366_v57 = vsel %vm333_vm1, %v840_v26, 0.0  ;;  %v382_v60 = vsel %vm333_vm1, %v850_v31, 0.0  ;;  %v438_v1 = vmul.f32 %v840_v26, %v840_v26  ;;  %v458_v5 = vmul.f32 %v850_v31, %v850_v31 }
  0xe4   :  { %v852_v32 = vpop.f32.mrb[7].mxu0  ;;  %v856_v34 = vpop.f32.mrb[7].mxu1  ;;  %v375_v52 = vsel %vm333_vm1, %v848_v30, 0.0  ;;  %v391_v54 = vsel %vm333_vm1, %v854_v33, 0.0  ;;  %v441_v59 = vmul.f32 %v848_v30, %v848_v30  ;;  %v448_v0 = vsel %vm333_vm1, %v440_v61, 0.0 }
  0xe5   :  { %v369_v56 = vsel %vm333_vm1, %v852_v32, 0.0  ;;  %v385_v58 = vsel %vm333_vm1, %v856_v34, 0.0  ;;  %v439_v62 = vmul.f32 %v852_v32, %v852_v32  ;;  %v459_v2 = vmul.f32 %v856_v34, %v856_v34 }
  0xe6   :  { %v451_v63 = vsel %vm333_vm1, %v441_v59, 0.0  ;;  %v442_v4 = vsel %vm333_vm1, %v438_v1, 0.0  ;;  %v461_v7 = vmul.f32 %v854_v33, %v854_v33  ;;  %v462_v8 = vsel %vm333_vm1, %v458_v5, 0.0 }
  0xe7   :  { %354 = vadd.xlane.f32.xlu1 %v353_v35  ;;  %409 = vadd.xlane.f32.xlu0 %v408_v37  ;;  %v445_v3 = vsel %vm333_vm1, %v439_v62, 0.0  ;;  %v465_v6 = vsel %vm333_vm1, %v459_v2, 0.0  ;;  %v468_v11 = vsel %vm333_vm1, %v460_v9, 0.0 }
  0xe8   :  { %v471_v10 = vsel %vm333_vm1, %v461_v7, 0.0 }
  0xeb   :  { %412 = vadd.xlane.f32.xlu1 %v411_v39  ;;  %429 = vadd.xlane.f32.xlu0 %v428_v41 }
  0xef   :  { %432 = vadd.xlane.f32.xlu1 %v431_v42  ;;  %338 = vadd.xlane.f32.xlu0 %v337_v44 }
  0xf3   :  { %406 = vadd.xlane.f32.xlu1 %v405_v46  ;;  %403 = vadd.xlane.f32.xlu0 %v402_v48 }
  0xf7   :  { %426 = vadd.xlane.f32.xlu1 %v425_v50  ;;  %423 = vadd.xlane.f32.xlu0 %v422_v51 }
  0xfb   :  { %376 = vadd.xlane.f32.xlu1 %v375_v52  ;;  %373 = vadd.xlane.f32.xlu0 %v372_v53 }
  0xff   :  { %392 = vadd.xlane.f32.xlu1 %v391_v54  ;;  %389 = vadd.xlane.f32.xlu0 %v388_v55 }
 0x103   :  { %370 = vadd.xlane.f32.xlu1 %v369_v56  ;;  %367 = vadd.xlane.f32.xlu0 %v366_v57 }
 0x107   :  { %386 = vadd.xlane.f32.xlu1 %v385_v58  ;;  %383 = vadd.xlane.f32.xlu0 %v382_v60 }
 0x10b   :  { %452 = vadd.xlane.f32.xlu1 %v451_v63  ;;  %449 = vadd.xlane.f32.xlu0 %v448_v0 }
 0x10f   :  { %446 = vadd.xlane.f32.xlu1 %v445_v3  ;;  %443 = vadd.xlane.f32.xlu0 %v442_v4 }
 0x113   :  { %466 = vadd.xlane.f32.xlu1 %v465_v6  ;;  %463 = vadd.xlane.f32.xlu0 %v462_v8 }
 0x117   :  { %472 = vadd.xlane.f32.xlu1 %v471_v10  ;;  %469 = vadd.xlane.f32.xlu0 %v468_v11 }
 0x168   :  { %v342_v17 = vpop.xlane.xlu1 %341  ;;  %v358_v21 = vpop.xlane.xlu0 %357 }
 0x169   :  { %v364_v57 = vadd.f32 %v358_v21, %v342_v17 }
 0x16c   :  { %v345_v23 = vpop.xlane.xlu1 %344  ;;  %v336_v25 = vpop.xlane.xlu0 %335 }
 0x170   :  { %v361_v28 = vpop.xlane.xlu1 %360  ;;  %v352_v29 = vpop.xlane.xlu0 %351 }
 0x171   :  { %v362_v53 = vadd.f32 %v352_v29, %v336_v25  ;;  %v365_v58 = vadd.f32 %v361_v28, %v345_v23 }
 0x174   :  { %v355_v35 = vpop.xlane.xlu1 %354  ;;  %v410_v36 = vpop.xlane.xlu0 %409 }
 0x178   :  { %v413_v37 = vpop.xlane.xlu1 %412  ;;  %v430_v38 = vpop.xlane.xlu0 %429 }
 0x179   :  { %v436_v11 = vadd.f32 %v430_v38, %v410_v36 }
 0x17c   :  { %v433_v39 = vpop.xlane.xlu1 %432  ;;  %v339_v40 = vpop.xlane.xlu0 %338 }
 0x17d   :  { %v363_v0 = vadd.f32 %v355_v35, %v339_v40  ;;  %v437_v9 = vadd.f32 %v433_v39, %v413_v37 }
 0x180   :  { %v407_v41 = vpop.xlane.xlu1 %406  ;;  %v404_v42 = vpop.xlane.xlu0 %403 }
 0x184   :  { %v427_v43 = vpop.xlane.xlu1 %426  ;;  %v424_v44 = vpop.xlane.xlu0 %423 }
 0x185   :  { %v434_v1 = vadd.f32 %v424_v44, %v404_v42  ;;  %v435_v4 = vadd.f32 %v427_v43, %v407_v41 }
 0x188   :  { %v377_v45 = vpop.xlane.xlu1 %376  ;;  %v374_v46 = vpop.xlane.xlu0 %373 }
 0x189   :  { %v380_v61 = vadd.f32 %v374_v46, %v364_v57  ;;  %v381_v62 = vadd.f32 %v377_v45, %v365_v58  ;;  %v502_v57 = vld [vmem:[%s1030_s2] sm:$0xff] }
 0x18c   :  { %v393_v47 = vpop.xlane.xlu1 %392  ;;  %v390_v48 = vpop.xlane.xlu0 %389 }
 0x18d   :  { %v396_v2 = vadd.f32 %v390_v48, %v380_v61  ;;  %v397_v3 = vadd.f32 %v393_v47, %v381_v62 }
 0x18f   :  { %v480_v23 = vmul.f32 0.03125, %v396_v2  ;;  %v481_v25 = vmul.f32 0.03125, %v397_v3  ;;  %v503_v3 = vld [vmem:[%s1030_s2 + $0x8] sm:$0xff] }
 0x190   :  { %v371_v49 = vpop.xlane.xlu1 %370  ;;  %v368_v50 = vpop.xlane.xlu0 %367 }
 0x191   :  { %v378_v56 = vadd.f32 %v368_v50, %v362_v53  ;;  %v379_v5 = vadd.f32 %v371_v49, %v363_v0  ;;  %v489_v48 = vmul.f32 %v481_v25, %v481_v25  ;;  %v488_v39 = vmul.f32 %v480_v23, %v480_v23  ;;  %v505_v0 = vld [vmem:[%s1030_s2 + $0x18] sm:$0xff] }
 0x194   :  { %v387_v51 = vpop.xlane.xlu1 %386  ;;  %v384_v52 = vpop.xlane.xlu0 %383 }
 0x195   :  { %v394_v59 = vadd.f32 %v384_v52, %v378_v56  ;;  %v395_v15 = vadd.f32 %v387_v51, %v379_v5 }
 0x197   :  { %v478_v6 = vmul.f32 0.03125, %v394_v59  ;;  %v479_v43 = vmul.f32 0.03125, %v395_v15 }
 0x198   :  { %v453_v54 = vpop.xlane.xlu1 %452  ;;  %v450_v55 = vpop.xlane.xlu0 %449 }
 0x199   :  { %v457_v28 = vadd.f32 %v453_v54, %v437_v9  ;;  %v486_v29 = vmul.f32 %v478_v6, %v478_v6  ;;  %v456_v45 = vadd.f32 %v450_v55, %v436_v11  ;;  %v487_v51 = vmul.f32 %v479_v43, %v479_v43 }
 0x19c   :  { %v447_v60 = vpop.xlane.xlu1 %446  ;;  %v444_v63 = vpop.xlane.xlu0 %443 }
 0x19d   :  { %v454_v7 = vadd.f32 %v444_v63, %v434_v1  ;;  %v455_v17 = vadd.f32 %v447_v60, %v435_v4  ;;  %v504_v60 = vld [vmem:[%s1030_s2 + $0x10] sm:$0xff] }
 0x1a0   :  { %v467_v8 = vpop.xlane.xlu1 %466  ;;  %v464_v10 = vpop.xlane.xlu0 %463 }
 0x1a1   :  { %v474_v21 = vadd.f32 %v464_v10, %v454_v7  ;;  %v475_v40 = vadd.f32 %v467_v8, %v455_v17  ;;  %v512_v7 = vld [vmem:[%s1031_s3 + $0x10] sm:$0xff]  ;;  %v510_v10 = vld [vmem:[%s1031_s3] sm:$0xff]  ;;  %v511_v17 = vld [vmem:[%s1031_s3 + $0x8] sm:$0xff] }
 0x1a3   :  { %v482_v35 = vmul.f32 0.03125, %v474_v21  ;;  %v483_v38 = vmul.f32 0.03125, %v475_v40 }
 0x1a4   :  { %v473_v42 = vpop.xlane.xlu1 %472  ;;  %v470_v44 = vpop.xlane.xlu0 %469 }
 0x1a5   :  { %v477_v41 = vadd.f32 %v473_v42, %v457_v28  ;;  %v490_v46 = vsub.f32 %v482_v35, %v486_v29  ;;  %v476_v47 = vadd.f32 %v470_v44, %v456_v45  ;;  %v491_v53 = vsub.f32 %v483_v38, %v487_v51  ;;  %v513_v28 = vld [vmem:[%s1031_s3 + $0x18] sm:$0xff] }
 0x1a7   :  { %v485_v37 = vmul.f32 0.03125, %v477_v41  ;;  %v494_v36 = vadd.f32 1e-05, %v490_v46  ;;  %v484_v49 = vmul.f32 0.03125, %v476_v47  ;;  %v495_v56 = vadd.f32 1e-05, %v491_v53 }
 0x1a9   :  { %v493_v50 = vsub.f32 %v485_v37, %v489_v48  ;;  %734 = vrsqrt.f32 %v494_v36  ;;  %v492_v52 = vsub.f32 %v484_v49, %v488_v39 }
 0x1ab   :  { %v496_v54 = vadd.f32 1e-05, %v492_v52  ;;  %v497_v55 = vadd.f32 1e-05, %v493_v50 }
 0x1ad   :  { %736 = vrsqrt.f32 %v496_v54 }
 0x1ae   :  { %738 = vrsqrt.f32 %v497_v55 }
 0x1af   :  { %740 = vrsqrt.f32 %v495_v56 }
 0x1b3   :  { %v735_v58 = vpop.eup %734 }
 0x1b4   :  { %v506_v59 = vmul.f32 %v735_v58, %v502_v57 }
 0x1b6   :  { %524 = vperm.xlu0 %720, %v506_v59   ;;  %v514_v9 = vmul.f32 %v506_v59, %v478_v6 }
 0x1b7   :  { %v737_v61 = vpop.eup %736 }
 0x1b8   :  { %v508_v62 = vmul.f32 %v737_v61, %v504_v60  ;;  %v739_v63 = vpop.eup %738  ;;  %v518_v11 = vsub.f32 %v510_v10, %v514_v9 }
 0x1b9   :  { %v509_v1 = vmul.f32 %v739_v63, %v505_v0  ;;  %v741_v2 = vpop.eup %740 }
 0x1ba   :  { %534 = vperm.xlu1 %721, %v508_v62   ;;  %v507_v4 = vmul.f32 %v741_v2, %v503_v3  ;;  %v516_v5 = vmul.f32 %v508_v62, %v480_v23 }
 0x1bb   :  { %v517_v23 = vmul.f32 %v509_v1, %v481_v25 }
 0x1bc   :  { %v520_v8 = vsub.f32 %v512_v7, %v516_v5  ;;  %v515_v15 = vmul.f32 %v507_v4, %v479_v43 }
 0x1bd   :  { %v521_v6 = vsub.f32 %v513_v28, %v517_v23 }
 0x1be   :  { %539 = vperm.xlu1 %721, %v509_v1   ;;  %v519_v21 = vsub.f32 %v511_v17, %v515_v15 }
 0x1c2   :  { %529 = vperm.xlu1 %721, %v507_v4  }
 0x1c6   :  { %558 = vperm.xlu1 %721, %v520_v8  }
 0x1ca   :  { %548 = vperm.xlu1 %721, %v518_v11  }
 0x1ce   :  { %553 = vperm.xlu1 %721, %v519_v21  }
 0x1d2   :  { %563 = vperm.xlu1 %721, %v521_v6  }
 0x235   :  { %v525_v40 = vpop.permute.xlu0 %524 }
 0x236   :  { %v542_v39 = vmul.f32 %v525_v40, %v816_v14  ;;  %v578_v36 = vmul.f32 %v525_v40, %v820_v16  ;;  %v595_v38 = vmul.f32 %v525_v40, %v840_v26  ;;  %v612_v49 = vmul.f32 %v525_v40, %v850_v31 }
 0x239   :  { %v535_v29 = vpop.permute.xlu1 %534 }
 0x23a   :  { %v544_v42 = vmul.f32 %v812_v12, %v535_v29  ;;  %v580_v44 = vmul.f32 %v814_v13, %v535_v29  ;;  %v597_v41 = vmul.f32 %v836_v24, %v535_v29  ;;  %v614_v43 = vmul.f32 %v842_v27, %v535_v29 }
 0x23d   :  { %v540_v45 = vpop.permute.xlu1 %539 }
 0x23e   :  { %v545_v60 = vmul.f32 %v824_v18, %v540_v45  ;;  %v581_v61 = vmul.f32 %v826_v19, %v540_v45  ;;  %v598_v62 = vmul.f32 %v848_v30, %v540_v45  ;;  %v615_v63 = vmul.f32 %v854_v33, %v540_v45 }
 0x241   :  { %v530_v35 = vpop.permute.xlu1 %529 }
 0x242   :  { %v543_v31 = vmul.f32 %v530_v35, %v828_v20  ;;  %v579_v52 = vmul.f32 %v530_v35, %v832_v22  ;;  %v596_v53 = vmul.f32 %v530_v35, %v852_v32  ;;  %v613_v54 = vmul.f32 %v530_v35, %v856_v34 }
 0x245   :  { %v559_v25 = vpop.permute.xlu1 %558 }
 0x246   :  { %v568_v46 = vadd.f32 %v559_v25, %v544_v42  ;;  %v584_v47 = vadd.f32 %v580_v44, %v559_v25  ;;  %v601_v48 = vadd.f32 %v597_v41, %v559_v25  ;;  %v618_v37 = vadd.f32 %v614_v43, %v559_v25 }
 0x248   :  { %v572_v12 = vmax.f32 %v568_v46, 0.0  ;;  %v588_v50 = vmax.f32 %v584_v47, 0.0  ;;  %v605_v13 = vmax.f32 %v601_v48, 0.0  ;;  %v622_v51 = vmax.f32 %v618_v37, 0.0 }
 0x249   :  { %v549_v24 = vpop.permute.xlu1 %548 }
 0x24a   :  { %576 = vst.msk [vmem:[%s1032_s4 + $0x10] sm:$0xff] %vm333_vm1, %v572_v12  ;;  %673 = vst.msk [vmem:[%s1032_s4 + $0x30] sm:$0xff] %vm333_vm1, %v588_v50  ;;  %v566_v14 = vadd.f32 %v549_v24, %v542_v39  ;;  %v582_v16 = vadd.f32 %v578_v36, %v549_v24  ;;  %v599_v26 = vadd.f32 %v595_v38, %v549_v24 }
 0x24b   :  { %677 = vst.msk [vmem:[%s1032_s4 + $0x50] sm:$0xff] %vm333_vm1, %v605_v13  ;;  %681 = vst.msk [vmem:[%s1032_s4 + $0x70] sm:$0xff] %vm333_vm1, %v622_v51  ;;  %v616_v27 = vadd.f32 %v612_v49, %v549_v24 }
 0x24c   :  { %v570_v55 = vmax.f32 %v566_v14, 0.0  ;;  %v586_v56 = vmax.f32 %v582_v16, 0.0  ;;  %v603_v57 = vmax.f32 %v599_v26, 0.0 }
 0x24d   :  { %v620_v58 = vmax.f32 %v616_v27, 0.0  ;;  %v554_v59 = vpop.permute.xlu1 %553 }
 0x24e   :  { %574 = vst.msk [vmem:[%s1032_s4] sm:$0xff] %vm333_vm1, %v570_v55  ;;  %671 = vst.msk [vmem:[%s1032_s4 + $0x20] sm:$0xff] %vm333_vm1, %v586_v56  ;;  %v567_v20 = vadd.f32 %v554_v59, %v543_v31  ;;  %v583_v22 = vadd.f32 %v579_v52, %v554_v59  ;;  %v600_v32 = vadd.f32 %v596_v53, %v554_v59 }
 0x24f   :  { %675 = vst.msk [vmem:[%s1032_s4 + $0x40] sm:$0xff] %vm333_vm1, %v603_v57  ;;  %679 = vst.msk [vmem:[%s1032_s4 + $0x60] sm:$0xff] %vm333_vm1, %v620_v58  ;;  %v617_v34 = vadd.f32 %v613_v54, %v554_v59 }
 0x250   :  { %v571_v0 = vmax.f32 %v567_v20, 0.0  ;;  %v587_v1 = vmax.f32 %v583_v22, 0.0  ;;  %v604_v2 = vmax.f32 %v600_v32, 0.0 }
 0x251   :  { %v621_v3 = vmax.f32 %v617_v34, 0.0  ;;  %v564_v4 = vpop.permute.xlu1 %563 }
 0x252   :  { %575 = vst.msk [vmem:[%s1032_s4 + $0x8] sm:$0xff] %vm333_vm1, %v571_v0  ;;  %672 = vst.msk [vmem:[%s1032_s4 + $0x28] sm:$0xff] %vm333_vm1, %v587_v1  ;;  %v569_v18 = vadd.f32 %v564_v4, %v545_v60  ;;  %v585_v19 = vadd.f32 %v581_v61, %v564_v4  ;;  %v602_v30 = vadd.f32 %v598_v62, %v564_v4 }
 0x253   :  { %676 = vst.msk [vmem:[%s1032_s4 + $0x48] sm:$0xff] %vm333_vm1, %v604_v2  ;;  %680 = vst.msk [vmem:[%s1032_s4 + $0x68] sm:$0xff] %vm333_vm1, %v621_v3  ;;  %v619_v33 = vadd.f32 %v615_v63, %v564_v4 }
 0x254   :  { %v573_v5 = vmax.f32 %v569_v18, 0.0  ;;  %v589_v7 = vmax.f32 %v585_v19, 0.0  ;;  %v606_v8 = vmax.f32 %v602_v30, 0.0 }
 0x255   :  { %v623_v9 = vmax.f32 %v619_v33, 0.0 }
 0x256   :  { %577 = vst.msk [vmem:[%s1032_s4 + $0x18] sm:$0xff] %vm333_vm1, %v573_v5  ;;  %674 = vst.msk [vmem:[%s1032_s4 + $0x38] sm:$0xff] %vm333_vm1, %v589_v7 }
 0x257   :  { %678 = vst.msk [vmem:[%s1032_s4 + $0x58] sm:$0xff] %vm333_vm1, %v606_v8  ;;  %682 = vst.msk [vmem:[%s1032_s4 + $0x78] sm:$0xff] %vm333_vm1, %v623_v9 }

// kernel: generator_forward.7
= control target key start
LH: loop header
LB: loop body
LE: loop exit
PB: predicated region body
PF: predicated region fallthrough
CT: control target
= control target key end

     0   :  { %v887_v0 = vmov 0.0   ;;  %vm888_vm0 = vmmov 0   ;;  %vm476_vm1 = vcmask 261120   ;;  %s1171_s0 = inlined_call_operand.vmem [shape: bf16[4,128,32], index: 0, kind: input, shape index: {}]   ;;  %s1172_s1 = inlined_call_operand.vmem [shape: bf16[4,16,128], index: 1, kind: input, shape index: {}]   ;;  %s1173_s2 = inlined_call_operand.vmem [shape: f32[16,1], index: 2, kind: input, shape index: {}]   ;;  %s1174_s3 = inlined_call_operand.vmem [shape: f32[16,1], index: 3, kind: input, shape index: {}]   ;;  %s1175_s4 = inlined_call_operand.vmem [shape: f32[4,16,32], index: 4, kind: output, shape index: {}]  }
   0x1   :  { %762 = vmatprep.subr.bf16.mxu0 %v887_v0  ;;  %782 = vmatprep.subr.bf16.mxu1 %v887_v0  ;;  %v847_v1 = vld [vmem:[%s1171_s0] sm:$0xff]   ;;  %v849_v3 = vld [vmem:[%s1171_s0 + $0x8] sm:$0xff]   ;;  %v851_v5 = vld [vmem:[%s1171_s0 + $0x10] sm:$0xff]  }
   0x2   :  { %v848_v2 = vld [vmem:[%s1171_s0 + $0x40] sm:$0xff]   ;;  %778 = vmatprep.mubr.msk.bf16.mxu0 %vm888_vm0, %v887_v0  ;;  %798 = vmatprep.mubr.msk.bf16.mxu1 %vm888_vm0, %v887_v0  ;;  %v850_v4 = vld [vmem:[%s1171_s0 + $0x48] sm:$0xff]   ;;  %v852_v6 = vld [vmem:[%s1171_s0 + $0x50] sm:$0xff]  }
   0x3   :  { %763 = vmatpush3.bf16.msra.mxu0 %v847_v1  ;;  %783 = vmatpush3.bf16.msra.mxu1 %v848_v2  ;;  %v853_v7 = vld [vmem:[%s1171_s0 + $0x18] sm:$0xff]   ;;  %v855_v9 = vld [vmem:[%s1171_s0 + $0x20] sm:$0xff]   ;;  %v857_v11 = vld [vmem:[%s1171_s0 + $0x28] sm:$0xff]  }
   0x4   :  { %764 = vmatprep.subr.bf16.mxu0 %v887_v0  ;;  %784 = vmatprep.subr.bf16.mxu1 %v887_v0  ;;  %v854_v8 = vld [vmem:[%s1171_s0 + $0x58] sm:$0xff]   ;;  %v856_v10 = vld [vmem:[%s1171_s0 + $0x60] sm:$0xff]   ;;  %v858_v12 = vld [vmem:[%s1171_s0 + $0x68] sm:$0xff]  }
   0x5   :  { %v859_v13 = vld [vmem:[%s1171_s0 + $0x30] sm:$0xff]   ;;  %v861_v15 = vld [vmem:[%s1171_s0 + $0x38] sm:$0xff]   ;;  %v863_v17 = vld [vmem:[%s1172_s1] sm:$0xff]  }
   0x6   :  { %v860_v14 = vld [vmem:[%s1171_s0 + $0x70] sm:$0xff]   ;;  %v862_v16 = vld [vmem:[%s1171_s0 + $0x78] sm:$0xff]   ;;  %v864_v18 = vld [vmem:[%s1172_s1 + $0x8] sm:$0xff]  }
   0x7   :  { %765 = vmatpush3.bf16.msra.mxu0 %v849_v3  ;;  %785 = vmatpush3.bf16.msra.mxu1 %v850_v4  ;;  %v865_v19 = vld [vmem:[%s1171_s0 + $0x80] sm:$0xff]   ;;  %v867_v21 = vld [vmem:[%s1171_s0 + $0x88] sm:$0xff]   ;;  %v869_v23 = vld [vmem:[%s1171_s0 + $0x90] sm:$0xff]  }
   0x8   :  { %766 = vmatprep.subr.bf16.mxu0 %v887_v0  ;;  %786 = vmatprep.subr.bf16.mxu1 %v887_v0  ;;  %v866_v20 = vld [vmem:[%s1171_s0 + $0xc0] sm:$0xff]   ;;  %v868_v22 = vld [vmem:[%s1171_s0 + $0xc8] sm:$0xff]   ;;  %v870_v24 = vld [vmem:[%s1171_s0 + $0xd0] sm:$0xff]  }
   0x9   :  { %v871_v25 = vld [vmem:[%s1171_s0 + $0x98] sm:$0xff]   ;;  %v873_v27 = vld [vmem:[%s1171_s0 + $0xa0] sm:$0xff]   ;;  %v875_v29 = vld [vmem:[%s1171_s0 + $0xa8] sm:$0xff]  }
   0xa   :  { %v872_v26 = vld [vmem:[%s1171_s0 + $0xd8] sm:$0xff]   ;;  %v874_v28 = vld [vmem:[%s1171_s0 + $0xe0] sm:$0xff]   ;;  %v876_v30 = vld [vmem:[%s1171_s0 + $0xe8] sm:$0xff]  }
   0xb   :  { %767 = vmatpush3.bf16.msra.mxu0 %v851_v5  ;;  %787 = vmatpush3.bf16.msra.mxu1 %v852_v6  ;;  %v877_v31 = vld [vmem:[%s1171_s0 + $0xb0] sm:$0xff]   ;;  %v879_v33 = vld [vmem:[%s1171_s0 + $0xb8] sm:$0xff]  }
   0xc   :  { %768 = vmatprep.subr.bf16.mxu0 %v887_v0  ;;  %788 = vmatprep.subr.bf16.mxu1 %v887_v0  ;;  %v878_v32 = vld [vmem:[%s1171_s0 + $0xf0] sm:$0xff]   ;;  %v880_v34 = vld [vmem:[%s1171_s0 + $0xf8] sm:$0xff]  }
   0xd   :  { %v881_v35 = vld [vmem:[%s1172_s1 + $0x10] sm:$0xff]   ;;  %v882_v36 = vld [vmem:[%s1172_s1 + $0x18] sm:$0xff]  }
   0xf   :  { %769 = vmatpush3.bf16.msra.mxu0 %v853_v7  ;;  %789 = vmatpush3.bf16.msra.mxu1 %v854_v8 }
  0x10   :  { %770 = vmatprep.subr.bf16.mxu0 %v887_v0  ;;  %790 = vmatprep.subr.bf16.mxu1 %v887_v0 }
  0x13   :  { %771 = vmatpush3.bf16.msra.mxu0 %v855_v9  ;;  %791 = vmatpush3.bf16.msra.mxu1 %v856_v10 }
  0x14   :  { %772 = vmatprep.subr.bf16.mxu0 %v887_v0  ;;  %792 = vmatprep.subr.bf16.mxu1 %v887_v0 }
  0x17   :  { %773 = vmatpush3.bf16.msra.mxu0 %v857_v11  ;;  %793 = vmatpush3.bf16.msra.mxu1 %v858_v12 }
  0x18   :  { %774 = vmatprep.subr.bf16.mxu0 %v887_v0  ;;  %794 = vmatprep.subr.bf16.mxu1 %v887_v0 }
  0x1b   :  { %775 = vmatpush3.bf16.msra.mxu0 %v859_v13  ;;  %795 = vmatpush3.bf16.msra.mxu1 %v860_v14  ;;  %v889_v13 = vmov 0  }
  0x1c   :  { %776 = vmatprep.subr.bf16.mxu0 %v887_v0  ;;  %796 = vmatprep.subr.bf16.mxu1 %v887_v0 }
  0x1d   :  { %845 = vset.pattern.permute.xlu0 %v889_v13  ;;  %846 = vset.pattern.permute.xlu1 %v889_v13 }
  0x1f   :  { %777 = vmatpush3.bf16.msra.mxu0 %v861_v15  ;;  %797 = vmatpush3.bf16.msra.mxu1 %v862_v16 }
  0x20   :  { %802 = vmatprep.subr.bf16.mxu0 %v887_v0  ;;  %822 = vmatprep.subr.bf16.mxu1 %v887_v0 }
  0x22   :  { %779 = vmatmul.mubr.bf16.vlgmr.msra.gmra.mrb[0].mxu0 %v863_v17  ;;  %799 = vmatmul.mubr.bf16.vlgmr.msra.gmra.mrb[0].mxu1 %v864_v18 }
  0x23   :  { %803 = vmatpush3.bf16.msra.mxu0 %v865_v19  ;;  %823 = vmatpush3.bf16.msra.mxu1 %v866_v20 }
  0x24   :  { %804 = vmatprep.subr.bf16.mxu0 %v887_v0  ;;  %824 = vmatprep.subr.bf16.mxu1 %v887_v0 }
  0x25   :  { %818 = vmatprep.mubr.msk.bf16.mxu0 %vm888_vm0, %v887_v0  ;;  %838 = vmatprep.mubr.msk.bf16.mxu1 %vm888_vm0, %v887_v0 }
  0x27   :  { %805 = vmatpush3.bf16.msra.mxu0 %v867_v21  ;;  %825 = vmatpush3.bf16.msra.mxu1 %v868_v22 }
  0x28   :  { %806 = vmatprep.subr.bf16.mxu0 %v887_v0  ;;  %826 = vmatprep.subr.bf16.mxu1 %v887_v0 }
  0x2b   :  { %807 = vmatpush3.bf16.msra.mxu0 %v869_v23  ;;  %827 = vmatpush3.bf16.msra.mxu1 %v870_v24 }
  0x2c   :  { %808 = vmatprep.subr.bf16.mxu0 %v887_v0  ;;  %828 = vmatprep.subr.bf16.mxu1 %v887_v0 }
  0x2f   :  { %809 = vmatpush3.bf16.msra.mxu0 %v871_v25  ;;  %829 = vmatpush3.bf16.msra.mxu1 %v872_v26 }
  0x30   :  { %810 = vmatprep.subr.bf16.mxu0 %v887_v0  ;;  %830 = vmatprep.subr.bf16.mxu1 %v887_v0 }
  0x33   :  { %811 = vmatpush3.bf16.msra.mxu0 %v873_v27  ;;  %831 = vmatpush3.bf16.msra.mxu1 %v874_v28 }
  0x34   :  { %812 = vmatprep.subr.bf16.mxu0 %v887_v0  ;;  %832 = vmatprep.subr.bf16.mxu1 %v887_v0 }
  0x37   :  { %813 = vmatpush3.bf16.msra.mxu0 %v875_v29  ;;  %833 = vmatpush3.bf16.msra.mxu1 %v876_v30 }
  0x38   :  { %814 = vmatprep.subr.bf16.mxu0 %v887_v0  ;;  %834 = vmatprep.subr.bf16.mxu1 %v887_v0 }
  0x3b   :  { %815 = vmatpush3.bf16.msra.mxu0 %v877_v31  ;;  %835 = vmatpush3.bf16.msra.mxu1 %v878_v32 }
  0x3c   :  { %816 = vmatprep.subr.bf16.mxu0 %v887_v0  ;;  %836 = vmatprep.subr.bf16.mxu1 %v887_v0 }
  0x3f   :  { %817 = vmatpush3.bf16.msra.mxu0 %v879_v33  ;;  %837 = vmatpush3.bf16.msra.mxu1 %v880_v34 }
  0x42   :  { %819 = vmatmul.mubr.bf16.vlgmr.msra.gmra.mrb[4].mxu0 %v881_v35  ;;  %839 = vmatmul.mubr.bf16.vlgmr.msra.gmra.mrb[4].mxu1 %v882_v36 }
  0xf5   :  { %v1063_v37 = vpop.f32.mrb[0].mxu0  ;;  %v1065_v38 = vpop.f32.mrb[0].mxu1 }
  0xf6   :  { %v780_v39 = vpop.f32.mrb[1].mxu0  ;;  %v477_v40 = vsel %vm476_vm1, %v1063_v37, 0.0  ;;  %v485_v41 = vsel %vm476_vm1, %v1065_v38, 0.0  ;;  %v800_v43 = vpop.f32.mrb[1].mxu1  ;;  %v509_v49 = vmul.f32 %v1063_v37, %v1063_v37  ;;  %v519_v52 = vmul.f32 %v1065_v38, %v1065_v38 }
  0xf7   :  { %478 = vadd.xlane.f32.xlu0 %v477_v40  ;;  %v1071_v42 = vpop.f32.mrb[2].mxu0  ;;  %486 = vadd.xlane.f32.xlu1 %v485_v41  ;;  %v1073_v45 = vpop.f32.mrb[2].mxu1 }
  0xf8   :  { %v781_v44 = vpop.f32.mrb[3].mxu0  ;;  %v801_v46 = vpop.f32.mrb[3].mxu1  ;;  %v488_v47 = vsel %vm476_vm1, %v1073_v45, 0.0  ;;  %v480_v48 = vsel %vm476_vm1, %v1071_v42, 0.0  ;;  %v510_v50 = vmul.f32 %v1071_v42, %v1071_v42  ;;  %v511_v51 = vsel %vm476_vm1, %v509_v49, 0.0 }
  0xf9   :  { %v520_v54 = vmul.f32 %v1073_v45, %v1073_v45  ;;  %v521_v55 = vsel %vm476_vm1, %v519_v52, 0.0 }
  0xfa   :  { %v514_v53 = vsel %vm476_vm1, %v510_v50, 0.0 }
  0xfb   :  { %481 = vadd.xlane.f32.xlu0 %v480_v48  ;;  %489 = vadd.xlane.f32.xlu1 %v488_v47  ;;  %v524_v56 = vsel %vm476_vm1, %v520_v54, 0.0 }
  0xff   :  { %512 = vadd.xlane.f32.xlu0 %v511_v51  ;;  %515 = vadd.xlane.f32.xlu1 %v514_v53 }
 0x103   :  { %522 = vadd.xlane.f32.xlu0 %v521_v55  ;;  %525 = vadd.xlane.f32.xlu1 %v524_v56  ;;  %v561_v56 = vld [vmem:[%s1173_s2] sm:$0xff] }
 0x115   :  { %v1091_v57 = vpop.f32.mrb[4].mxu0  ;;  %v1093_v59 = vpop.f32.mrb[4].mxu1 }
 0x116   :  { %v820_v58 = vpop.f32.mrb[5].mxu0  ;;  %v493_v60 = vsel %vm476_vm1, %v1091_v57, 0.0  ;;  %v840_v61 = vpop.f32.mrb[5].mxu1  ;;  %v501_v2 = vsel %vm476_vm1, %v1093_v59, 0.0  ;;  %v529_v4 = vmul.f32 %v1091_v57, %v1091_v57  ;;  %v539_v8 = vmul.f32 %v1093_v59, %v1093_v59 }
 0x117   :  { %494 = vadd.xlane.f32.xlu0 %v493_v60  ;;  %v1097_v62 = vpop.f32.mrb[6].mxu0  ;;  %v1099_v0 = vpop.f32.mrb[6].mxu1  ;;  %v562_v60 = vld [vmem:[%s1173_s2 + $0x8] sm:$0xff] }
 0x118   :  { %v821_v63 = vpop.f32.mrb[7].mxu0  ;;  %v496_v1 = vsel %vm476_vm1, %v1097_v62, 0.0  ;;  %v841_v3 = vpop.f32.mrb[7].mxu1  ;;  %v504_v5 = vsel %vm476_vm1, %v1099_v0, 0.0  ;;  %v530_v6 = vmul.f32 %v1097_v62, %v1097_v62  ;;  %v531_v7 = vsel %vm476_vm1, %v529_v4, 0.0 }
 0x119   :  { %497 = vadd.xlane.f32.xlu1 %v496_v1  ;;  %v540_v10 = vmul.f32 %v1099_v0, %v1099_v0  ;;  %v541_v11 = vsel %vm476_vm1, %v539_v8, 0.0  ;;  %v565_v3 = vld [vmem:[%s1174_s3] sm:$0xff] }
 0x11a   :  { %v534_v9 = vsel %vm476_vm1, %v530_v6, 0.0  ;;  %v566_v6 = vld [vmem:[%s1174_s3 + $0x8] sm:$0xff] }
 0x11b   :  { %502 = vadd.xlane.f32.xlu0 %v501_v2  ;;  %v544_v12 = vsel %vm476_vm1, %v540_v10, 0.0 }
 0x11d   :  { %505 = vadd.xlane.f32.xlu1 %v504_v5 }
 0x11f   :  { %532 = vadd.xlane.f32.xlu0 %v531_v7 }
 0x121   :  { %535 = vadd.xlane.f32.xlu1 %v534_v9 }
 0x123   :  { %542 = vadd.xlane.f32.xlu0 %v541_v11 }
 0x125   :  { %545 = vadd.xlane.f32.xlu1 %v544_v12 }
 0x184   :  { %v479_v14 = vpop.xlane.xlu0 %478  ;;  %v487_v15 = vpop.xlane.xlu1 %486 }
 0x185   :  { %v491_v24 = vadd.f32 %v487_v15, %v479_v14 }
 0x188   :  { %v482_v16 = vpop.xlane.xlu0 %481  ;;  %v490_v17 = vpop.xlane.xlu1 %489 }
 0x189   :  { %v492_v26 = vadd.f32 %v490_v17, %v482_v16 }
 0x18c   :  { %v513_v18 = vpop.xlane.xlu0 %512  ;;  %v516_v19 = vpop.xlane.xlu1 %515 }
 0x190   :  { %v523_v20 = vpop.xlane.xlu0 %522  ;;  %v526_v21 = vpop.xlane.xlu1 %525 }
 0x191   :  { %v527_v32 = vadd.f32 %v523_v20, %v513_v18  ;;  %v528_v35 = vadd.f32 %v526_v21, %v516_v19 }
 0x1a4   :  { %v495_v22 = vpop.xlane.xlu0 %494 }
 0x1a5   :  { %v499_v27 = vadd.f32 %v495_v22, %v491_v24 }
 0x1a6   :  { %v498_v23 = vpop.xlane.xlu1 %497 }
 0x1a7   :  { %v500_v29 = vadd.f32 %v498_v23, %v492_v26 }
 0x1a8   :  { %v503_v25 = vpop.xlane.xlu0 %502 }
 0x1a9   :  { %v507_v30 = vadd.f32 %v503_v25, %v499_v27 }
 0x1aa   :  { %v506_v28 = vpop.xlane.xlu1 %505 }
 0x1ab   :  { %v508_v33 = vadd.f32 %v506_v28, %v500_v29  ;;  %v549_v36 = vmul.f32 0.0078125, %v507_v30 }
 0x1ac   :  { %v533_v31 = vpop.xlane.xlu0 %532 }
 0x1ad   :  { %v537_v39 = vadd.f32 %v533_v31, %v527_v32  ;;  %v550_v41 = vmul.f32 0.0078125, %v508_v33  ;;  %v553_v47 = vmul.f32 %v549_v36, %v549_v36 }
 0x1ae   :  { %v536_v34 = vpop.xlane.xlu1 %535 }
 0x1af   :  { %v538_v43 = vadd.f32 %v536_v34, %v528_v35  ;;  %v554_v50 = vmul.f32 %v550_v41, %v550_v41 }
 0x1b0   :  { %v543_v40 = vpop.xlane.xlu0 %542 }
 0x1b1   :  { %v547_v44 = vadd.f32 %v543_v40, %v537_v39 }
 0x1b2   :  { %v546_v46 = vpop.xlane.xlu1 %545 }
 0x1b3   :  { %v551_v48 = vmul.f32 0.0078125, %v547_v44  ;;  %v548_v49 = vadd.f32 %v546_v46, %v538_v43 }
 0x1b5   :  { %v555_v51 = vsub.f32 %v551_v48, %v553_v47  ;;  %v552_v52 = vmul.f32 0.0078125, %v548_v49 }
 0x1b7   :  { %v557_v53 = vadd.f32 1e-05, %v555_v51  ;;  %v556_v54 = vsub.f32 %v552_v52, %v554_v50 }
 0x1b9   :  { %883 = vrsqrt.f32 %v557_v53  ;;  %v558_v55 = vadd.f32 1e-05, %v556_v54 }
 0x1bb   :  { %885 = vrsqrt.f32 %v558_v55 }
 0x1c3   :  { %v884_v58 = vpop.eup %883 }
 0x1c4   :  { %v563_v61 = vmul.f32 %v884_v58, %v561_v56 }
 0x1c5   :  { %v886_v63 = vpop.eup %885 }
 0x1c6   :  { %573 = vperm.xlu0 %845, %v563_v61   ;;  %v564_v1 = vmul.f32 %v886_v63, %v562_v60  ;;  %v567_v2 = vmul.f32 %v563_v61, %v549_v36 }
 0x1c8   :  { %578 = vperm.xlu1 %846, %v564_v1   ;;  %v569_v4 = vsub.f32 %v565_v3, %v567_v2  ;;  %v568_v5 = vmul.f32 %v564_v1, %v550_v41 }
 0x1ca   :  { %v570_v7 = vsub.f32 %v566_v6, %v568_v5 }
 0x1cc   :  { %585 = vperm.xlu1 %846, %v569_v4  }
 0x1d0   :  { %590 = vperm.xlu1 %846, %v570_v7  }
 0x245   :  { %v574_v8 = vpop.permute.xlu0 %573 }
 0x246   :  { %v581_v10 = vmul.f32 %v574_v8, %v1063_v37  ;;  %v599_v11 = vmul.f32 %v574_v8, %v1065_v38  ;;  %v608_v12 = vmul.f32 %v574_v8, %v1091_v57  ;;  %v617_v13 = vmul.f32 %v574_v8, %v1093_v59 }
 0x247   :  { %v579_v9 = vpop.permute.xlu1 %578 }
 0x248   :  { %v582_v19 = vmul.f32 %v579_v9, %v1071_v42  ;;  %v600_v20 = vmul.f32 %v579_v9, %v1073_v45  ;;  %v609_v21 = vmul.f32 %v579_v9, %v1097_v62  ;;  %v618_v22 = vmul.f32 %v579_v9, %v1099_v0 }
 0x24b   :  { %v586_v14 = vpop.permute.xlu1 %585 }
 0x24c   :  { %v593_v15 = vadd.f32 %v586_v14, %v581_v10  ;;  %v601_v16 = vadd.f32 %v599_v11, %v586_v14  ;;  %v610_v17 = vadd.f32 %v608_v12, %v586_v14  ;;  %v619_v18 = vadd.f32 %v617_v13, %v586_v14 }
 0x24e   :  { %v595_v37 = vmax.f32 %v593_v15, 0.0  ;;  %v603_v23 = vmax.f32 %v601_v16, 0.0  ;;  %v612_v38 = vmax.f32 %v610_v17, 0.0  ;;  %v621_v24 = vmax.f32 %v619_v18, 0.0 }
 0x24f   :  { %v591_v57 = vpop.permute.xlu1 %590 }
 0x250   :  { %597 = vst.msk [vmem:[%s1175_s4] sm:$0xff] %vm476_vm1, %v595_v37  ;;  %720 = vst.msk [vmem:[%s1175_s4 + $0x10] sm:$0xff] %vm476_vm1, %v603_v23  ;;  %v594_v42 = vadd.f32 %v591_v57, %v582_v19  ;;  %v602_v45 = vadd.f32 %v600_v20, %v591_v57  ;;  %v611_v59 = vadd.f32 %v609_v21, %v591_v57 }
 0x251   :  { %722 = vst.msk [vmem:[%s1175_s4 + $0x20] sm:$0xff] %vm476_vm1, %v612_v38  ;;  %724 = vst.msk [vmem:[%s1175_s4 + $0x30] sm:$0xff] %vm476_vm1, %v621_v24  ;;  %v620_v62 = vadd.f32 %v618_v22, %v591_v57 }
 0x252   :  { %v596_v0 = vmax.f32 %v594_v42, 0.0  ;;  %v604_v25 = vmax.f32 %v602_v45, 0.0  ;;  %v613_v26 = vmax.f32 %v611_v59, 0.0 }
 0x253   :  { %v622_v27 = vmax.f32 %v620_v62, 0.0 }
 0x254   :  { %598 = vst.msk [vmem:[%s1175_s4 + $0x8] sm:$0xff] %vm476_vm1, %v596_v0  ;;  %721 = vst.msk [vmem:[%s1175_s4 + $0x18] sm:$0xff] %vm476_vm1, %v604_v25 }
 0x255   :  { %723 = vst.msk [vmem:[%s1175_s4 + $0x28] sm:$0xff] %vm476_vm1, %v613_v26  ;;  %725 = vst.msk [vmem:[%s1175_s4 + $0x38] sm:$0xff] %vm476_vm1, %v622_v27 }

// kernel: generator_forward.8
= control target key start
LH: loop header
LB: loop body
LE: loop exit
PB: predicated region body
PF: predicated region fallthrough
CT: control target
= control target key end

     0   :  { %v542_v0 = vmov 0.0   ;;  %vm543_vm0 = vmmov 0   ;;  %vm51_vm1 = vcmask 523264   ;;  %v544_v41 = vmov 0   ;;  %s656_s0 = inlined_call_operand.vmem [shape: bf16[4,64,128], index: 0, kind: input, shape index: {}]   ;;  %s657_s1 = inlined_call_operand.vmem [shape: bf16[4,8,64], index: 1, kind: input, shape index: {}]   ;;  %s658_s2 = inlined_call_operand.vmem [shape: f32[8,1], index: 2, kind: input, shape index: {}]   ;;  %s659_s3 = inlined_call_operand.vmem [shape: f32[8,1], index: 3, kind: input, shape index: {}]   ;;  %s660_s4 = inlined_call_operand.vmem [shape: f32[4,8,128], index: 4, kind: output, shape index: {}]  }
   0x1   :  { %471 = vmatprep.subr.bf16.mxu0 %v542_v0  ;;  %v524_v1 = vld [vmem:[%s656_s0] sm:$0xff]   ;;  %483 = vmatprep.subr.bf16.mxu1 %v542_v0  ;;  %v526_v3 = vld [vmem:[%s656_s0 + $0x8] sm:$0xff]   ;;  %v528_v5 = vld [vmem:[%s656_s0 + $0x10] sm:$0xff]  }
   0x2   :  { %v525_v2 = vld [vmem:[%s656_s0 + $0x20] sm:$0xff]   ;;  %479 = vmatprep.mubr.msk.bf16.mxu0 %vm543_vm0, %v542_v0  ;;  %491 = vmatprep.mubr.msk.bf16.mxu1 %vm543_vm0, %v542_v0  ;;  %v527_v4 = vld [vmem:[%s656_s0 + $0x28] sm:$0xff]   ;;  %v529_v6 = vld [vmem:[%s656_s0 + $0x30] sm:$0xff]  }
   0x3   :  { %472 = vmatpush3.bf16.msra.mxu0 %v524_v1  ;;  %484 = vmatpush3.bf16.msra.mxu1 %v525_v2  ;;  %v530_v7 = vld [vmem:[%s656_s0 + $0x18] sm:$0xff]   ;;  %v18_v9 = vld [vmem:[%s657_s1] sm:$0xf]  ;;  %v406_v11 = vld [vmem:[%s657_s1 + $0x4] sm:$0xf] }
   0x4   :  { %473 = vmatprep.subr.bf16.mxu0 %v542_v0  ;;  %485 = vmatprep.subr.bf16.mxu1 %v542_v0  ;;  %v531_v8 = vld [vmem:[%s656_s0 + $0x38] sm:$0xff]   ;;  %v532_v10 = vld [vmem:[%s656_s0 + $0x40] sm:$0xff]   ;;  %v534_v13 = vld [vmem:[%s656_s0 + $0x48] sm:$0xff]  }
   0x5   :  { %v533_v12 = vld [vmem:[%s656_s0 + $0x60] sm:$0xff]   ;;  %v535_v14 = vld [vmem:[%s656_s0 + $0x68] sm:$0xff]   ;;  %v536_v15 = vld [vmem:[%s656_s0 + $0x50] sm:$0xff]   ;;  %522 = vset.pattern.permute.xlu0 %v544_v41  ;;  %523 = vset.pattern.permute.xlu1 %v544_v41 }
   0x6   :  { %v537_v16 = vld [vmem:[%s656_s0 + $0x70] sm:$0xff]   ;;  %v538_v17 = vld [vmem:[%s656_s0 + $0x58] sm:$0xff]   ;;  %v420_v19 = vld [vmem:[%s657_s1 + $0x8] sm:$0xf] }
   0x7   :  { %474 = vmatpush3.bf16.msra.mxu0 %v526_v3  ;;  %486 = vmatpush3.bf16.msra.mxu1 %v527_v4  ;;  %v539_v18 = vld [vmem:[%s656_s0 + $0x78] sm:$0xff]   ;;  %v434_v20 = vld [vmem:[%s657_s1 + $0xc] sm:$0xf]  ;;  %v363_v61 = vld [vmem:[%s658_s2] sm:$0xff] }
   0x8   :  { %475 = vmatprep.subr.bf16.mxu0 %v542_v0  ;;  %487 = vmatprep.subr.bf16.mxu1 %v542_v0 }
   0xb   :  { %476 = vmatpush3.bf16.msra.mxu0 %v528_v5  ;;  %488 = vmatpush3.bf16.msra.mxu1 %v529_v6 }
   0xc   :  { %477 = vmatprep.subr.bf16.mxu0 %v542_v0  ;;  %489 = vmatprep.subr.bf16.mxu1 %v542_v0 }
   0xf   :  { %478 = vmatpush3.bf16.msra.mxu0 %v530_v7  ;;  %490 = vmatpush3.bf16.msra.mxu1 %v531_v8 }
  0x10   :  { %495 = vmatprep.subr.bf16.mxu0 %v542_v0  ;;  %507 = vmatprep.subr.bf16.mxu1 %v542_v0 }
  0x12   :  { %480 = vmatmul.mubr.msk.bf16.vlgmr.msra.gmra.mrb[0].mxu0 %vm51_vm1, %v18_v9  ;;  %492 = vmatmul.mubr.msk.bf16.vlgmr.msra.gmra.mrb[0].mxu1 %vm51_vm1, %v406_v11 }
  0x13   :  { %496 = vmatpush3.bf16.msra.mxu0 %v532_v10  ;;  %508 = vmatpush3.bf16.msra.mxu1 %v533_v12 }
  0x14   :  { %497 = vmatprep.subr.bf16.mxu0 %v542_v0  ;;  %509 = vmatprep.subr.bf16.mxu1 %v542_v0 }
  0x15   :  { %503 = vmatprep.mubr.msk.bf16.mxu0 %vm543_vm0, %v542_v0  ;;  %515 = vmatprep.mubr.msk.bf16.mxu1 %vm543_vm0, %v542_v0 }
  0x17   :  { %498 = vmatpush3.bf16.msra.mxu0 %v534_v13  ;;  %510 = vmatpush3.bf16.msra.mxu1 %v535_v14 }
  0x18   :  { %499 = vmatprep.subr.bf16.mxu0 %v542_v0  ;;  %511 = vmatprep.subr.bf16.mxu1 %v542_v0 }
  0x1b   :  { %500 = vmatpush3.bf16.msra.mxu0 %v536_v15  ;;  %512 = vmatpush3.bf16.msra.mxu1 %v537_v16 }
  0x1c   :  { %501 = vmatprep.subr.bf16.mxu0 %v542_v0  ;;  %513 = vmatprep.subr.bf16.mxu1 %v542_v0  ;;  %v365_v0 = vld [vmem:[%s659_s3] sm:$0xff] }
  0x1f   :  { %502 = vmatpush3.bf16.msra.mxu0 %v538_v17  ;;  %514 = vmatpush3.bf16.msra.mxu1 %v539_v18 }
  0x22   :  { %504 = vmatmul.mubr.msk.bf16.vlgmr.msra.gmra.mrb[4].mxu0 %vm51_vm1, %v420_v19  ;;  %516 = vmatmul.mubr.msk.bf16.vlgmr.msra.gmra.mrb[4].mxu1 %vm51_vm1, %v434_v20 }
  0xe5   :  { %v89_v21 = vpop.f32.mrb[0].mxu0  ;;  %v167_v23 = vpop.f32.mrb[0].mxu1 }
  0xe6   :  { %329 = vadd.xlane.f32.xlu0 %v89_v21  ;;  %v481_v22 = vpop.f32.mrb[1].mxu0  ;;  %v341_v24 = vmul.f32 %v89_v21, %v89_v21  ;;  %v493_v26 = vpop.f32.mrb[1].mxu1  ;;  %v345_v30 = vmul.f32 %v167_v23, %v167_v23 }
  0xe7   :  { %v92_v25 = vpop.f32.mrb[2].mxu0  ;;  %v170_v28 = vpop.f32.mrb[2].mxu1 }
  0xe8   :  { %v482_v27 = vpop.f32.mrb[3].mxu0  ;;  %342 = vadd.xlane.f32.xlu1 %v341_v24  ;;  %v494_v29 = vpop.f32.mrb[3].mxu1 }
  0xea   :  { %332 = vadd.xlane.f32.xlu0 %v167_v23 }
  0xee   :  { %346 = vadd.xlane.f32.xlu0 %v345_v30 }
  0xf5   :  { %v245_v31 = vpop.f32.mrb[4].mxu0  ;;  %v323_v32 = vpop.f32.mrb[4].mxu1 }
  0xf6   :  { %335 = vadd.xlane.f32.xlu1 %v245_v31  ;;  %v505_v33 = vpop.f32.mrb[5].mxu0  ;;  %v349_v34 = vmul.f32 %v245_v31, %v245_v31  ;;  %v517_v36 = vpop.f32.mrb[5].mxu1  ;;  %v353_v40 = vmul.f32 %v323_v32, %v323_v32 }
  0xf7   :  { %v248_v35 = vpop.f32.mrb[6].mxu0  ;;  %v326_v37 = vpop.f32.mrb[6].mxu1 }
  0xf8   :  { %350 = vadd.xlane.f32.xlu0 %v349_v34  ;;  %v506_v38 = vpop.f32.mrb[7].mxu0  ;;  %v518_v39 = vpop.f32.mrb[7].mxu1 }
  0xfa   :  { %338 = vadd.xlane.f32.xlu1 %v323_v32 }
  0xfe   :  { %354 = vadd.xlane.f32.xlu1 %v353_v40 }
 0x173   :  { %v330_v42 = vpop.xlane.xlu0 %329 }
 0x175   :  { %v343_v44 = vpop.xlane.xlu1 %342 }
 0x177   :  { %v333_v43 = vpop.xlane.xlu0 %332 }
 0x178   :  { %v334_v47 = vadd.f32 %v333_v43, %v330_v42 }
 0x17b   :  { %v347_v45 = vpop.xlane.xlu0 %346 }
 0x17c   :  { %v348_v51 = vadd.f32 %v347_v45, %v343_v44 }
 0x183   :  { %v336_v46 = vpop.xlane.xlu1 %335 }
 0x184   :  { %v337_v48 = vadd.f32 %v336_v46, %v334_v47 }
 0x185   :  { %v351_v49 = vpop.xlane.xlu0 %350 }
 0x186   :  { %v352_v53 = vadd.f32 %v351_v49, %v348_v51 }
 0x187   :  { %v339_v50 = vpop.xlane.xlu1 %338 }
 0x188   :  { %v340_v52 = vadd.f32 %v339_v50, %v337_v48 }
 0x18a   :  { %v357_v54 = vmul.f32 0.001953125, %v340_v52 }
 0x18b   :  { %v355_v55 = vpop.xlane.xlu1 %354 }
 0x18c   :  { %v356_v56 = vadd.f32 %v355_v55, %v352_v53  ;;  %v359_v57 = vmul.f32 %v357_v54, %v357_v54 }
 0x18e   :  { %v358_v58 = vmul.f32 0.001953125, %v356_v56 }
 0x190   :  { %v360_v59 = vsub.f32 %v358_v58, %v359_v57 }
 0x192   :  { %v361_v60 = vadd.f32 1e-05, %v360_v59 }
 0x194   :  { %540 = vrsqrt.f32 %v361_v60 }
 0x19e   :  { %v541_v62 = vpop.eup %540 }
 0x19f   :  { %v364_v63 = vmul.f32 %v541_v62, %v363_v61 }
 0x1a1   :  { %370 = vperm.xlu0 %522, %v364_v63   ;;  %v366_v1 = vmul.f32 %v364_v63, %v357_v54 }
 0x1a3   :  { %v367_v2 = vsub.f32 %v365_v0, %v366_v1 }
 0x1a5   :  { %376 = vperm.xlu1 %523, %v367_v2  }
 0x220   :  { %v371_v3 = vpop.permute.xlu0 %370 }
 0x221   :  { %v373_v4 = vmul.f32 %v371_v3, %v89_v21  ;;  %v382_v5 = vmul.f32 %v371_v3, %v167_v23  ;;  %v387_v6 = vmul.f32 %v371_v3, %v245_v31  ;;  %v392_v7 = vmul.f32 %v371_v3, %v323_v32 }
 0x224   :  { %v377_v8 = vpop.permute.xlu1 %376 }
 0x225   :  { %v379_v9 = vadd.f32 %v377_v8, %v373_v4  ;;  %v383_v10 = vadd.f32 %v382_v5, %v377_v8  ;;  %v388_v11 = vadd.f32 %v387_v6, %v377_v8  ;;  %v393_v12 = vadd.f32 %v392_v7, %v377_v8 }
 0x227   :  { %v380_v13 = vmax.f32 %v379_v9, 0.0  ;;  %v384_v14 = vmax.f32 %v383_v10, 0.0  ;;  %v389_v15 = vmax.f32 %v388_v11, 0.0  ;;  %v394_v16 = vmax.f32 %v393_v12, 0.0 }
 0x229   :  { %381 = vst [vmem:[%s660_s4] sm:$0xff] %v380_v13  ;;  %448 = vst [vmem:[%s660_s4 + $0x8] sm:$0xff] %v384_v14 }
 0x22a   :  { %449 = vst [vmem:[%s660_s4 + $0x10] sm:$0xff] %v389_v15  ;;  %450 = vst [vmem:[%s660_s4 + $0x18] sm:$0xff] %v394_v16 }

// kernel: generator_forward.9
= control target key start
LH: loop header
LB: loop body
LE: loop exit
PB: predicated region body
PF: predicated region fallthrough
CT: control target
= control target key end

     0   :  { %v772_v1 = vmov 0   ;;  %vm61_vm0 = vcmask 261120   ;;  %s936_s0 = inlined_call_operand.vmem [shape: bf16[4,32,512], index: 0, kind: input, shape index: {}]   ;;  %s937_s1 = inlined_call_operand.vmem [shape: bf16[4,3,32], index: 1, kind: input, shape index: {}]   ;;  %s938_s2 = inlined_call_operand.vmem [shape: f32[4,3,512], index: 2, kind: output, shape index: {}]  }
   0x1   :  { %v692_v0 = vld [vmem:[%s936_s0 + $0x4] ss:$16 sps:$4 sm:$0xff]   ;;  %97 = vmatprep.mubr.bf16.mxu0 %v772_v1  ;;  %138 = vmatprep.mubr.bf16.mxu1 %v772_v1  ;;  %v694_v2 = vld [vmem:[%s936_s0 + $0xc] ss:$16 sps:$4 sm:$0xff]   ;;  %v696_v3 = vld [vmem:[%s936_s0] ss:$16 sps:$4 sm:$0xff]  }
   0x2   :  { %65 = vmatprep.subr.bf16.mxu0 %v692_v0  ;;  %v697_v4 = vld [vmem:[%s936_s0 + $0x8] ss:$16 sps:$4 sm:$0xff]   ;;  %106 = vmatprep.subr.bf16.mxu1 %v694_v2  ;;  %v698_v5 = vld [vmem:[%s936_s0 + $0x24] ss:$16 sps:$4 sm:$0xff]   ;;  %v700_v6 = vld [vmem:[%s936_s0 + $0x2c] ss:$16 sps:$4 sm:$0xff]  }
   0x3   :  { %66 = vmatpush1.bf16.msra.mxu0 %v696_v3  ;;  %107 = vmatpush1.bf16.msra.mxu1 %v697_v4  ;;  %v702_v7 = vld [vmem:[%s936_s0 + $0x20] ss:$16 sps:$4 sm:$0xff]   ;;  %v703_v8 = vld [vmem:[%s936_s0 + $0x28] ss:$16 sps:$4 sm:$0xff]   ;;  %v706_v11 = vld [vmem:[%s936_s0 + $0x44] ss:$16 sps:$4 sm:$0xff]  }
   0x4   :  { %67 = vmatprep.subr.bf16.mxu0 %v698_v5  ;;  %108 = vmatprep.subr.bf16.mxu1 %v700_v6  ;;  %v12_v9 = vld [vmem:[%s937_s1] sm:$0x3]  ;;  %v707_v12 = vld [vmem:[%s936_s0 + $0x48] ss:$16 sps:$4 sm:$0xff]   ;;  %v709_v13 = vld [vmem:[%s936_s0 + $0x4c] ss:$16 sps:$4 sm:$0xff]  }
   0x5   :  { %v704_v10 = vld [vmem:[%s936_s0 + $0x40] ss:$16 sps:$4 sm:$0xff]   ;;  %v712_v14 = vld [vmem:[%s936_s0 + $0x64] ss:$16 sps:$4 sm:$0xff]   ;;  %v715_v15 = vld [vmem:[%s936_s0 + $0x6c] ss:$16 sps:$4 sm:$0xff]  }
   0x6   :  { %v710_v16 = vld [vmem:[%s936_s0 + $0x60] ss:$16 sps:$4 sm:$0xff]   ;;  %v713_v17 = vld [vmem:[%s936_s0 + $0x68] ss:$16 sps:$4 sm:$0xff]   ;;  %v718_v18 = vld [vmem:[%s936_s0 + $0x84] ss:$16 sps:$4 sm:$0xff]  }
   0x7   :  { %68 = vmatpush1.bf16.msra.mxu0 %v702_v7  ;;  %109 = vmatpush1.bf16.msra.mxu1 %v703_v8  ;;  %v721_v19 = vld [vmem:[%s936_s0 + $0x8c] ss:$16 sps:$4 sm:$0xff]   ;;  %v628_v20 = vld [vmem:[%s937_s1 + $0x2] sm:$0x3]  ;;  %v719_v22 = vld [vmem:[%s936_s0 + $0x88] ss:$16 sps:$4 sm:$0xff]  }
   0x8   :  { %215 = vmatprep.subr.bf16.mxu0 %v706_v11  ;;  %256 = vmatprep.subr.bf16.mxu1 %v709_v13  ;;  %v716_v21 = vld [vmem:[%s936_s0 + $0x80] ss:$16 sps:$4 sm:$0xff]   ;;  %v724_v23 = vld [vmem:[%s936_s0 + $0xa4] ss:$16 sps:$4 sm:$0xff]   ;;  %v727_v24 = vld [vmem:[%s936_s0 + $0xac] ss:$16 sps:$4 sm:$0xff]  }
   0x9   :  { %v722_v25 = vld [vmem:[%s936_s0 + $0xa0] ss:$16 sps:$4 sm:$0xff]   ;;  %v725_v26 = vld [vmem:[%s936_s0 + $0xa8] ss:$16 sps:$4 sm:$0xff]   ;;  %v730_v27 = vld [vmem:[%s936_s0 + $0xc4] ss:$16 sps:$4 sm:$0xff]  }
   0xa   :  { %626 = vmatmul.mubr.msk.bf16.vlgmr.msra.gmra.mrb[0].mxu0 %vm61_vm0, %v12_v9  ;;  %627 = vmatmul.mubr.msk.bf16.vlgmr.msra.gmra.mrb[0].mxu1 %vm61_vm0, %v12_v9  ;;  %v733_v28 = vld [vmem:[%s936_s0 + $0xcc] ss:$16 sps:$4 sm:$0xff]   ;;  %v649_v29 = vld [vmem:[%s937_s1 + $0x4] sm:$0x3]  ;;  %v728_v30 = vld [vmem:[%s936_s0 + $0xc0] ss:$16 sps:$4 sm:$0xff]  }
   0xb   :  { %216 = vmatpush1.bf16.msra.mxu0 %v704_v10  ;;  %257 = vmatpush1.bf16.msra.mxu1 %v707_v12  ;;  %v731_v31 = vld [vmem:[%s936_s0 + $0xc8] ss:$16 sps:$4 sm:$0xff]   ;;  %v736_v32 = vld [vmem:[%s936_s0 + $0xe4] ss:$16 sps:$4 sm:$0xff]   ;;  %v739_v33 = vld [vmem:[%s936_s0 + $0xec] ss:$16 sps:$4 sm:$0xff]  }
   0xc   :  { %217 = vmatprep.subr.bf16.mxu0 %v712_v14  ;;  %258 = vmatprep.subr.bf16.mxu1 %v715_v15  ;;  %v734_v34 = vld [vmem:[%s936_s0 + $0xe0] ss:$16 sps:$4 sm:$0xff]   ;;  %v737_v35 = vld [vmem:[%s936_s0 + $0xe8] ss:$16 sps:$4 sm:$0xff]   ;;  %v670_v36 = vld [vmem:[%s937_s1 + $0x6] sm:$0x3] }
   0xd   :  { %247 = vmatprep.mubr.bf16.mxu0 %v772_v1  ;;  %288 = vmatprep.mubr.bf16.mxu1 %v772_v1 }
   0xf   :  { %218 = vmatpush1.bf16.msra.mxu0 %v710_v16  ;;  %259 = vmatpush1.bf16.msra.mxu1 %v713_v17 }
  0x10   :  { %366 = vmatprep.subr.bf16.mxu0 %v718_v18  ;;  %407 = vmatprep.subr.bf16.mxu1 %v721_v19 }
  0x12   :  { %645 = vmatmul.mubr.msk.bf16.vlgmr.msra.gmra.mrb[4].mxu0 %vm61_vm0, %v628_v20  ;;  %646 = vmatmul.mubr.msk.bf16.vlgmr.msra.gmra.mrb[4].mxu1 %vm61_vm0, %v628_v20 }
  0x13   :  { %367 = vmatpush1.bf16.msra.mxu0 %v716_v21  ;;  %408 = vmatpush1.bf16.msra.mxu1 %v719_v22 }
  0x14   :  { %368 = vmatprep.subr.bf16.mxu0 %v724_v23  ;;  %409 = vmatprep.subr.bf16.mxu1 %v727_v24 }
  0x15   :  { %398 = vmatprep.mubr.bf16.mxu0 %v772_v1  ;;  %439 = vmatprep.mubr.bf16.mxu1 %v772_v1 }
  0x17   :  { %369 = vmatpush1.bf16.msra.mxu0 %v722_v25  ;;  %410 = vmatpush1.bf16.msra.mxu1 %v725_v26 }
  0x18   :  { %517 = vmatprep.subr.bf16.mxu0 %v730_v27  ;;  %558 = vmatprep.subr.bf16.mxu1 %v733_v28 }
  0x1a   :  { %666 = vmatmul.mubr.msk.bf16.vlgmr.msra.gmra.mrb[8].mxu0 %vm61_vm0, %v649_v29  ;;  %667 = vmatmul.mubr.msk.bf16.vlgmr.msra.gmra.mrb[8].mxu1 %vm61_vm0, %v649_v29 }
  0x1b   :  { %518 = vmatpush1.bf16.msra.mxu0 %v728_v30  ;;  %559 = vmatpush1.bf16.msra.mxu1 %v731_v31 }
  0x1c   :  { %519 = vmatprep.subr.bf16.mxu0 %v736_v32  ;;  %560 = vmatprep.subr.bf16.mxu1 %v739_v33 }
  0x1d   :  { %549 = vmatprep.mubr.bf16.mxu0 %v772_v1  ;;  %590 = vmatprep.mubr.bf16.mxu1 %v772_v1 }
  0x1f   :  { %520 = vmatpush1.bf16.msra.mxu0 %v734_v34  ;;  %561 = vmatpush1.bf16.msra.mxu1 %v737_v35 }
  0x22   :  { %687 = vmatmul.mubr.msk.bf16.vlgmr.msra.gmra.mrb[12].mxu0 %vm61_vm0, %v670_v36  ;;  %688 = vmatmul.mubr.msk.bf16.vlgmr.msra.gmra.mrb[12].mxu1 %vm61_vm0, %v670_v36 }
  0xdd   :  { %v99_v37 = vpop.f32.mrb[0].mxu0  ;;  %v140_v38 = vpop.f32.mrb[0].mxu1 }
  0xde   :  { %740 = vtanh.f32 %v99_v37  ;;  %v101_v39 = vpop.f32.mrb[1].mxu0  ;;  %v142_v40 = vpop.f32.mrb[1].mxu1 }
  0xdf   :  { %742 = vtanh.f32 %v140_v38  ;;  %v103_v41 = vpop.f32.mrb[2].mxu0  ;;  %v144_v42 = vpop.f32.mrb[2].mxu1 }
  0xe0   :  { %744 = vtanh.f32 %v101_v39  ;;  %v104_v43 = vpop.f32.mrb[3].mxu0  ;;  %v145_v44 = vpop.f32.mrb[3].mxu1 }
  0xe1   :  { %746 = vtanh.f32 %v142_v40 }
  0xe5   :  { %v249_v45 = vpop.f32.mrb[4].mxu0  ;;  %v290_v46 = vpop.f32.mrb[4].mxu1 }
  0xe6   :  { %748 = vtanh.f32 %v249_v45  ;;  %v251_v47 = vpop.f32.mrb[5].mxu0  ;;  %v292_v48 = vpop.f32.mrb[5].mxu1 }
  0xe7   :  { %750 = vtanh.f32 %v290_v46  ;;  %v253_v49 = vpop.f32.mrb[6].mxu0  ;;  %v294_v50 = vpop.f32.mrb[6].mxu1 }
  0xe8   :  { %v741_v51 = vpop.eup %740  ;;  %752 = vtanh.f32 %v251_v47  ;;  %v254_v52 = vpop.f32.mrb[7].mxu0 }
  0xe9   :  { %v295_v53 = vpop.f32.mrb[7].mxu1  ;;  %v743_v54 = vpop.eup %742  ;;  %754 = vtanh.f32 %v292_v48 }
  0xea   :  { %v745_v55 = vpop.eup %744 }
  0xeb   :  { %v747_v56 = vpop.eup %746  ;;  %v155_v57 = vcombine.low %v741_v51, %v745_v55 }
  0xec   :  { %v156_v58 = vcombine.low %v743_v54, %v747_v56 }
  0xed   :  { %159 = vst [vmem:[%s938_s2] sm:$0x77] %v155_v57  ;;  %v400_v59 = vpop.f32.mrb[8].mxu0  ;;  %v441_v60 = vpop.f32.mrb[8].mxu1 }
  0xee   :  { %160 = vst [vmem:[%s938_s2 + $0x8] sm:$0x77] %v156_v58  ;;  %756 = vtanh.f32 %v400_v59  ;;  %v402_v61 = vpop.f32.mrb[9].mxu0  ;;  %v443_v62 = vpop.f32.mrb[9].mxu1 }
  0xef   :  { %758 = vtanh.f32 %v441_v60  ;;  %v404_v63 = vpop.f32.mrb[10].mxu0  ;;  %v445_v0 = vpop.f32.mrb[10].mxu1 }
  0xf0   :  { %v749_v1 = vpop.eup %748  ;;  %760 = vtanh.f32 %v402_v61  ;;  %v405_v2 = vpop.f32.mrb[11].mxu0 }
  0xf1   :  { %v446_v3 = vpop.f32.mrb[11].mxu1  ;;  %v751_v4 = vpop.eup %750  ;;  %762 = vtanh.f32 %v443_v62 }
  0xf2   :  { %v753_v5 = vpop.eup %752 }
  0xf3   :  { %v755_v6 = vpop.eup %754  ;;  %v305_v7 = vcombine.low %v749_v1, %v753_v5 }
  0xf4   :  { %v306_v8 = vcombine.low %v751_v4, %v755_v6 }
  0xf5   :  { %647 = vst [vmem:[%s938_s2 + $0x10] sm:$0x77] %v305_v7  ;;  %v551_v9 = vpop.f32.mrb[12].mxu0  ;;  %v592_v10 = vpop.f32.mrb[12].mxu1 }
  0xf6   :  { %648 = vst [vmem:[%s938_s2 + $0x18] sm:$0x77] %v306_v8  ;;  %764 = vtanh.f32 %v551_v9  ;;  %v553_v11 = vpop.f32.mrb[13].mxu0  ;;  %v594_v12 = vpop.f32.mrb[13].mxu1 }
  0xf7   :  { %766 = vtanh.f32 %v592_v10  ;;  %v555_v13 = vpop.f32.mrb[14].mxu0  ;;  %v596_v14 = vpop.f32.mrb[14].mxu1 }
  0xf8   :  { %v757_v15 = vpop.eup %756  ;;  %768 = vtanh.f32 %v553_v11  ;;  %v556_v16 = vpop.f32.mrb[15].mxu0 }
  0xf9   :  { %v597_v17 = vpop.f32.mrb[15].mxu1  ;;  %v759_v18 = vpop.eup %758  ;;  %770 = vtanh.f32 %v594_v12 }
  0xfa   :  { %v761_v19 = vpop.eup %760 }
  0xfb   :  { %v763_v20 = vpop.eup %762  ;;  %v456_v21 = vcombine.low %v757_v15, %v761_v19 }
  0xfc   :  { %v457_v22 = vcombine.low %v759_v18, %v763_v20 }
  0xfd   :  { %668 = vst [vmem:[%s938_s2 + $0x20] sm:$0x77] %v456_v21 }
  0xfe   :  { %669 = vst [vmem:[%s938_s2 + $0x28] sm:$0x77] %v457_v22 }
 0x100   :  { %v765_v23 = vpop.eup %764 }
 0x101   :  { %v767_v24 = vpop.eup %766 }
 0x102   :  { %v769_v25 = vpop.eup %768 }
 0x103   :  { %v771_v26 = vpop.eup %770  ;;  %v607_v27 = vcombine.low %v765_v23, %v769_v25 }
 0x104   :  { %v608_v28 = vcombine.low %v767_v24, %v771_v26 }
 0x105   :  { %689 = vst [vmem:[%s938_s2 + $0x30] sm:$0x77] %v607_v27 }
 0x106   :  { %690 = vst [vmem:[%s938_s2 + $0x38] sm:$0x77] %v608_v28 }

</bundles_post_ra>
